<compile_context>
chip_gen: v6e
topology: v6e:2x2x1
jax: 0.10.0
libtpu: 0.0.40
codegen_flags: <defaults>
</compile_context>

<pallas_src>
import jax
import jax.numpy as jnp
from jax.experimental import pallas as pl
from jax.experimental.pallas import tpu as pltpu

# ----------------- config (small shapes consistent with the module) -----------------
D_MODEL   = 32                                   # config.hidden_size
EXPAND    = 2                                    # config.expand
D_INNER   = EXPAND * D_MODEL                     # 64
HEADDIM   = 16                                   # config.headdim
NHEADS    = D_INNER // HEADDIM                   # 4
D_STATE   = 16                                   # config.d_state
NGROUPS   = 1
D_CONV    = 4                                    # config.d_conv
CHUNK     = 64                                   # min(config.chunk_size, max_position_embeddings)
CONV_DIM  = D_INNER + 2 * NGROUPS * D_STATE      # 96
D_IN_PROJ = 2 * D_INNER + 2 * NGROUPS * D_STATE + 2 * NHEADS  # 168
IS_PRENORM = False                               # config.is_prenorm (BERT post-norm)
LN_EPS    = 1e-5
RMS_EPS   = 1e-5

BATCH  = 2
SEQLEN = 8


def _softplus(v):
    # numerically stable softplus (avoids exp overflow of log(1 + exp(v)))
    return jnp.maximum(v, 0.0) + jnp.log(1.0 + jnp.exp(-jnp.abs(v)))


# ===================== fused BertLayer kernel (one batch element per grid step) =====================
def _bert_layer_kernel(u_ref, ln_w_ref, ln_b_ref,
                       wz_ref, wx_ref, wB_ref, wC_ref, wdtf_ref, wdtb_ref,
                       cwx_ref, cbx_ref, cwB_ref, cbB_ref, cwC_ref, cbC_ref,
                       dt_bias_ref, a_neg_ref, fcD_ref, Dp_ref, rms_w_ref, outw_ref,
                       o_ref):
    f32 = jnp.float32
    L = u_ref.shape[1]

    u = u_ref[0].astype(f32)                                   # (L, D) padded activations
    ln_w = ln_w_ref[...].astype(f32)
    ln_b = ln_b_ref[...].astype(f32)

    def layer_norm(v):
        mu = jnp.mean(v, axis=-1, keepdims=True)
        var = jnp.mean((v - mu) ** 2, axis=-1, keepdims=True)
        return (v - mu) * jax.lax.rsqrt(var + LN_EPS) * ln_w + ln_b

    h = layer_norm(u) if IS_PRENORM else u

    # ---------------- in_proj (weight pre-split in the wrapper; no bias) ----------------
    z   = jnp.dot(h, wz_ref[...].astype(f32),   preferred_element_type=f32)   # (L, d_inner)
    xr  = jnp.dot(h, wx_ref[...].astype(f32),   preferred_element_type=f32)   # (L, d_inner)
    Br  = jnp.dot(h, wB_ref[...].astype(f32),   preferred_element_type=f32)   # (L, d_state)
    Cr  = jnp.dot(h, wC_ref[...].astype(f32),   preferred_element_type=f32)   # (L, d_state)
    dtf = jnp.dot(h, wdtf_ref[...].astype(f32), preferred_element_type=f32)   # (L, H)
    dtb = jnp.dot(h, wdtb_ref[...].astype(f32), preferred_element_type=f32)   # (L, H)

    # time-shift matrices S_s[t, t-s] = 1 (zero fill) -> shifts become tiny MXU matmuls
    rr = jax.lax.broadcasted_iota(jnp.int32, (L, L), 0)
    cc = jax.lax.broadcasted_iota(jnp.int32, (L, L), 1)

    def shift_mat(s):
        return (rr - cc == s).astype(f32)

    # ---------------- depthwise causal conv1d (+ bias) + SiLU ----------------
    def conv_silu(v, w_ref2, b_ref2):
        acc = jnp.zeros_like(v) + b_ref2[...].astype(f32)
        for j in range(D_CONV):                                # static tap loop
            s = D_CONV - 1 - j                                 # tap j reads x[t - s]
            sv = v if s == 0 else jnp.dot(shift_mat(s), v, preferred_element_type=f32)
            acc = acc + sv * w_ref2[j:j + 1, :].astype(f32)
        return acc * jax.nn.sigmoid(acc)                       # SiLU

    x  = conv_silu(xr, cwx_ref, cbx_ref)                       # (L, d_inner)
    Bm = conv_silu(Br, cwB_ref, cbB_ref)                       # (L, d_state)
    Cm = conv_silu(Cr, cwC_ref, cbC_ref)                       # (L, d_state)

    # ---------------- bidirectional single-chunk SSD (no sequence flips) ----------------
    #   fwd: y_f[t] = sum_{s<=t} (C_t.B_s) exp(sum_{s<k<=t} dA_f[k]) dt_f[s] x[s]
    #   bwd: y_b[t] = sum_{s>=t} (C_t.B_s) exp(sum_{t<=k<s} dA_b[k]) dt_b[s] x[s]
    dt_bias = dt_bias_ref[...].astype(f32)                     # (1, H)
    a_neg   = a_neg_ref[...].astype(f32)                       # (1, H)  A = -exp(A_log)
    dtf_sp = _softplus(dtf + dt_bias)                          # (L, H)
    dtb_sp = _softplus(dtb + dt_bias)
    daf = dtf_sp * a_neg
    dab = dtb_sp * a_neg

    ltri = (rr >= cc).astype(f32)                              # lower triangular incl. diag
    utri = (rr <= cc).astype(f32)                              # upper triangular incl. diag

    cs_f  = jnp.dot(ltri, daf, preferred_element_type=f32)            # inclusive cumsum (L, H)
    ecs_b = jnp.dot(ltri, dab, preferred_element_type=f32) - dab      # exclusive cumsum (L, H)

    # C_t . B_s shared by every head and both directions (ngroups == 1)
    cb = jax.lax.dot_general(Cm, Bm, (((1,), (1,)), ((), ())),
                             preferred_element_type=f32)              # (L, L)

    # per-head scalar -> per-channel expansion via a constant 0/1 matmul (no jnp.repeat)
    eh = jax.lax.broadcasted_iota(jnp.int32, (NHEADS, D_INNER), 0)
    ec = jax.lax.broadcasted_iota(jnp.int32, (NHEADS, D_INNER), 1)
    expand = jnp.logical_and(ec >= eh * HEADDIM, ec < (eh + 1) * HEADDIM).astype(f32)

    def per_channel(m):                                        # (L, H) -> (L, d_inner)
        return jnp.dot(m, expand, preferred_element_type=f32)

    # head-dependent decay enters only as row/column diagonal scalings, so one
    # (L, L) @ (L, d_inner) matmul per direction handles all heads at once.
    y_f = per_channel(jnp.exp(cs_f)) * jnp.dot(
        ltri * cb, per_channel(jnp.exp(-cs_f) * dtf_sp) * x, preferred_element_type=f32)
    y_b = per_channel(jnp.exp(-ecs_b)) * jnp.dot(
        utri * cb, per_channel(jnp.exp(ecs_b) * dtb_sp) * x, preferred_element_type=f32)

    # quasi-separable recombine: shift fwd by +1 / bwd by -1 off the diagonal,
    # then add the diagonal term x * (fc_D(x) + D) broadcast per head.
    y_f = jnp.dot(shift_mat(1), y_f, preferred_element_type=f32)
    y_b = jnp.dot(shift_mat(-1), y_b, preferred_element_type=f32)
    dterm = jnp.dot(x, fcD_ref[...].astype(f32), preferred_element_type=f32) \
        + Dp_ref[...].astype(f32)                              # (L, H)
    y = y_f + y_b + x * per_channel(dterm)

    # ---------------- gated RMSNorm: norm(y * SiLU(z)) * w ----------------
    g = y * (z * jax.nn.sigmoid(z))
    ms = jnp.mean(g * g, axis=-1, keepdims=True)
    yn = g * jax.lax.rsqrt(ms + RMS_EPS) * rms_w_ref[...].astype(f32)

    # ---------------- out_proj + residual + (post-)LayerNorm ----------------
    out = jnp.dot(yn, outw_ref[...].astype(f32), preferred_element_type=f32) + u
    if not IS_PRENORM:
        out = layer_norm(out)
    o_ref[0] = out.astype(o_ref.dtype)


def _wspec(shape):
    nd = len(shape)
    return pl.BlockSpec(shape, lambda b: (0,) * nd)


# ----------------------------- BertLayer / BertUnpadMixer forward -----------------------------
def bert_layer_forward(params, hidden_states, cu_seqlens, seqlen,
                       subset_idx=None, indices=None, attn_mask=None, forward_rnn=False):
    """hidden_states: (total_nnz, D) -> (total_nnz, D) (or gathered by subset_idx)."""
    del attn_mask, forward_rnn       # validity carried by `indices`; explicit mixer path only
    batch = int(cu_seqlens.shape[0]) - 1
    d = hidden_states.shape[-1]
    assert seqlen <= CHUNK  # TODO(synk): multi-chunk SSD scan not implemented (single chunk exact for L <= chunk_size)

    # pad_input (scatter); residual add + post-LN are fused into the kernel, so only
    # one gather remains afterwards.
    # TODO(synk): fold the row scatter/gather into the kernel via PrefetchScalarGridSpec
    # + pl.Element index maps once shapes grow beyond toy sizes.
    padded = jnp.zeros((batch * seqlen, d), hidden_states.dtype).at[indices].set(hidden_states)
    padded = padded.reshape(batch, seqlen, d)

    # split the in_proj weight once: [z | x | B | C | dt_fwd | dt_bwd], already transposed
    wt = params["in_proj_w"].T                                     # (D, d_in_proj)
    o0 = D_INNER
    o1 = 2 * D_INNER
    o2 = o1 + NGROUPS * D_STATE
    o3 = o2 + NGROUPS * D_STATE
    wz, wx_, wB, wC = wt[:, :o0], wt[:, o0:o1], wt[:, o1:o2], wt[:, o2:o3]
    wdtf, wdtb = wt[:, o3:o3 + NHEADS], wt[:, o3 + NHEADS:]

    cw, cb_ = params["conv_w"], params["conv_b"].reshape(1, CONV_DIM)
    cwx, cwB, cwC = cw[:, :D_INNER], cw[:, D_INNER:D_INNER + D_STATE], cw[:, D_INNER + D_STATE:]
    cbx, cbB, cbC = cb_[:, :D_INNER], cb_[:, D_INNER:D_INNER + D_STATE], cb_[:, D_INNER + D_STATE:]

    operands = (
        padded,
        params["ln_w"].reshape(1, d), params["ln_b"].reshape(1, d),
        wz, wx_, wB, wC, wdtf, wdtb,
        cwx, cbx, cwB, cbB, cwC, cbC,
        params["dt_bias"].reshape(1, NHEADS),
        (-jnp.exp(params["A_log"])).reshape(1, NHEADS),
        params["fc_D_w"].T,                                    # (d_inner, H)
        params["D"].reshape(1, NHEADS),
        params["rms_w"].reshape(1, D_INNER),
        params["out_proj_w"].T,                                # (d_inner, D)
    )
    in_specs = [pl.BlockSpec((1, seqlen, d), lambda b: (b, 0, 0))] + \
               [_wspec(op.shape) for op in operands[1:]]

    mixed = pl.pallas_call(
        _bert_layer_kernel,
        out_shape=jax.ShapeDtypeStruct((batch, seqlen, d), jnp.float32),
        grid=(batch,),
        in_specs=in_specs,
        out_specs=pl.BlockSpec((1, seqlen, d), lambda b: (b, 0, 0)),
        compiler_params=pltpu.CompilerParams(dimension_semantics=("parallel",)),
    )(*operands)

    # unpad gather (kernel already applied residual + LayerNorm row-wise)
    out = mixed.reshape(batch * seqlen, d)[indices]
    if subset_idx is not None:
        out = out[subset_idx]                                  # index_first_axis
    return out


# ----------------------------- pure-JAX reference (original flip-based formulation) ---------------
def _reference_forward(params, hidden_states, indices, batch, seqlen):
    d = hidden_states.shape[-1]

    def ln(v, w, b):
        mu = jnp.mean(v, axis=-1, keepdims=True)
        var = jnp.mean((v - mu) ** 2, axis=-1, keepdims=True)
        return (v - mu) * jax.lax.rsqrt(var + LN_EPS) * w + b

    h = hidden_states
    if IS_PRENORM:
        h = ln(h, params["ln_w"], params["ln_b"])
    u = jnp.zeros((batch * seqlen, d), h.dtype).at[indices].set(h).reshape(batch, seqlen, d)
    L = seqlen

    zxbcdt = u @ params["in_proj_w"].T
    z = zxbcdt[..., :D_INNER]
    xbc = zxbcdt[..., D_INNER:D_INNER + CONV_DIM]
    dt_raw = zxbcdt[..., D_INNER + CONV_DIM:]

    xpad = jnp.pad(xbc, ((0, 0), (D_CONV - 1, 0), (0, 0)))
    conv = params["conv_b"] + sum(xpad[:, j:j + L, :] * params["conv_w"][j] for j in range(D_CONV))
    xbc_a = conv * jax.nn.sigmoid(conv)
    x = xbc_a[..., :D_INNER]
    bm = xbc_a[..., D_INNER:D_INNER + D_STATE]
    cm = xbc_a[..., D_INNER + D_STATE:]
    x_og = x

    dt2 = jnp.concatenate([dt_raw[..., :NHEADS], jnp.flip(dt_raw[..., NHEADS:], axis=1)], axis=0)
    x2 = jnp.concatenate([x, jnp.flip(x, axis=1)], axis=0)
    b2 = jnp.concatenate([bm, jnp.flip(bm, axis=1)], axis=0)
    c2 = jnp.concatenate([cm, jnp.flip(cm, axis=1)], axis=0)

    a_neg = -jnp.exp(params["A_log"])
    dtsp = _softplus(dt2 + params["dt_bias"])                  # (2B, L, H)
    da = dtsp * a_neg
    cs = jnp.cumsum(da, axis=1)
    seg = cs[:, :, None, :] - cs[:, None, :, :]
    tt = jnp.arange(L)[:, None]
    ss = jnp.arange(L)[None, :]
    decay = jnp.where((tt >= ss)[None, :, :, None], jnp.exp(seg), 0.0)
    cbm = jnp.einsum("bln,bmn->blm", c2, b2)
    m = cbm[..., None] * decay * dtsp[:, None, :, :]
    xh = x2.reshape(2 * batch, L, NHEADS, HEADDIM)
    y = jnp.einsum("btsh,bshp->bthp", m, xh).reshape(2 * batch, L, D_INNER)

    y = jnp.roll(y, 1, axis=1).at[:, 0, :].set(0.0)
    y = y[:batch] + jnp.flip(y[batch:], axis=1)
    dterm = x_og @ params["fc_D_w"].T + params["D"]
    y = y + x_og * jnp.repeat(dterm, HEADDIM, axis=-1)

    g = y * (z * jax.nn.sigmoid(z))
    yn = g * jax.lax.rsqrt(jnp.mean(g * g, axis=-1, keepdims=True) + RMS_EPS) * params["rms_w"]
    mixed = yn @ params["out_proj_w"].T

    out = mixed.reshape(batch * seqlen, d)[indices] + hidden_states
    if not IS_PRENORM:
        out = ln(out, params["ln_w"], params["ln_b"])
    return out


if __name__ == "__main__":
    key = jax.random.PRNGKey(0)
    k = jax.random.split(key, 8)
    params = {
        "ln_w": jnp.ones((D_MODEL,), jnp.float32),
        "ln_b": jnp.zeros((D_MODEL,), jnp.float32),
        "in_proj_w": 0.05 * jax.random.normal(k[0], (D_IN_PROJ, D_MODEL), jnp.float32),
        # conv_w[j, c] corresponds to torch Conv1d weight[c, 0, j]
        "conv_w": 0.2 * jax.random.normal(k[1], (D_CONV, CONV_DIM), jnp.float32),
        "conv_b": 0.02 * jax.random.normal(k[2], (CONV_DIM,), jnp.float32),
        "dt_bias": 0.1 * jax.random.normal(k[3], (NHEADS,), jnp.float32),
        "A_log": jnp.log(jnp.arange(1, NHEADS + 1, dtype=jnp.float32)),
        "D": jnp.ones((NHEADS,), jnp.float32),
        "fc_D_w": 0.05 * jax.random.normal(k[4], (NHEADS, D_INNER), jnp.float32),
        "rms_w": jnp.ones((D_INNER,), jnp.float32),
        "out_proj_w": 0.05 * jax.random.normal(k[5], (D_MODEL, D_INNER), jnp.float32),
    }

    # two sequences of lengths 8 and 6 -> total_nnz = 14
    attn_mask = jnp.array([[1] * SEQLEN, [1] * 6 + [0] * 2], jnp.int32)   # (B, L)
    total_nnz = 14
    indices = jnp.nonzero(attn_mask.reshape(-1), size=total_nnz)[0]       # (total_nnz,)
    cu_seqlens = jnp.array([0, 8, 14], jnp.int32)                         # (B + 1,)
    hidden_states = jax.random.normal(k[6], (total_nnz, D_MODEL), jnp.float32)

    out = bert_layer_forward(params, hidden_states, cu_seqlens, SEQLEN,
                             subset_idx=None, indices=indices, attn_mask=attn_mask,
                             forward_rnn=False)
    out = jax.block_until_ready(out)
    assert out.shape == (total_nnz, D_MODEL)
    assert bool(jnp.all(jnp.isfinite(out)))

    ref = _reference_forward(params, hidden_states, indices, BATCH, SEQLEN)
    assert bool(jnp.allclose(out, ref, rtol=1e-3, atol=1e-3)), \
        ("max abs diff", float(jnp.max(jnp.abs(out - ref))))
    print("KERNEL_OK")
</pallas_src>

<mosaic_0001>
module attributes {stable_mosaic.version = 11 : i64} {
  func.func @_bert_layer_kernel(%arg0: i32, %arg1: memref<1x8x32xf32, #tpu.memory_space<vmem>>, %arg2: memref<1x32xf32, #tpu.memory_space<vmem>>, %arg3: memref<1x32xf32, #tpu.memory_space<vmem>>, %arg4: memref<32x64xf32, #tpu.memory_space<vmem>>, %arg5: memref<32x64xf32, #tpu.memory_space<vmem>>, %arg6: memref<32x16xf32, #tpu.memory_space<vmem>>, %arg7: memref<32x16xf32, #tpu.memory_space<vmem>>, %arg8: memref<32x4xf32, #tpu.memory_space<vmem>>, %arg9: memref<32x4xf32, #tpu.memory_space<vmem>>, %arg10: memref<4x64xf32, #tpu.memory_space<vmem>>, %arg11: memref<1x64xf32, #tpu.memory_space<vmem>>, %arg12: memref<4x16xf32, #tpu.memory_space<vmem>>, %arg13: memref<1x16xf32, #tpu.memory_space<vmem>>, %arg14: memref<4x16xf32, #tpu.memory_space<vmem>>, %arg15: memref<1x16xf32, #tpu.memory_space<vmem>>, %arg16: memref<1x4xf32, #tpu.memory_space<vmem>>, %arg17: memref<1x4xf32, #tpu.memory_space<vmem>>, %arg18: memref<64x4xf32, #tpu.memory_space<vmem>>, %arg19: memref<1x4xf32, #tpu.memory_space<vmem>>, %arg20: memref<1x64xf32, #tpu.memory_space<vmem>>, %arg21: memref<64x32xf32, #tpu.memory_space<vmem>>, %arg22: memref<1x8x32xf32, #tpu.memory_space<vmem>>) attributes {dimension_semantics = [#tpu.dimension_semantics<parallel>], iteration_bounds = array<i64: 2>, scalar_prefetch = 0 : i64, scratch_operands = 0 : i64, tpu.core_type = #tpu.core_type<tc>, window_params = [{transform_indices = @transform_0, window_bounds = array<i64: 1, 8, 32>}, {pipeline_mode = #tpu.pipeline_mode<synchronous>, transform_indices = @transform_1, window_bounds = array<i64: 1, 32>}, {pipeline_mode = #tpu.pipeline_mode<synchronous>, transform_indices = @transform_2, window_bounds = array<i64: 1, 32>}, {pipeline_mode = #tpu.pipeline_mode<synchronous>, transform_indices = @transform_3, window_bounds = array<i64: 32, 64>}, {pipeline_mode = #tpu.pipeline_mode<synchronous>, transform_indices = @transform_4, window_bounds = array<i64: 32, 64>}, {pipeline_mode = #tpu.pipeline_mode<synchronous>, transform_indices = @transform_5, window_bounds = array<i64: 32, 16>}, {pipeline_mode = #tpu.pipeline_mode<synchronous>, transform_indices = @transform_6, window_bounds = array<i64: 32, 16>}, {pipeline_mode = #tpu.pipeline_mode<synchronous>, transform_indices = @transform_7, window_bounds = array<i64: 32, 4>}, {pipeline_mode = #tpu.pipeline_mode<synchronous>, transform_indices = @transform_8, window_bounds = array<i64: 32, 4>}, {pipeline_mode = #tpu.pipeline_mode<synchronous>, transform_indices = @transform_9, window_bounds = array<i64: 4, 64>}, {pipeline_mode = #tpu.pipeline_mode<synchronous>, transform_indices = @transform_10, window_bounds = array<i64: 1, 64>}, {pipeline_mode = #tpu.pipeline_mode<synchronous>, transform_indices = @transform_11, window_bounds = array<i64: 4, 16>}, {pipeline_mode = #tpu.pipeline_mode<synchronous>, transform_indices = @transform_12, window_bounds = array<i64: 1, 16>}, {pipeline_mode = #tpu.pipeline_mode<synchronous>, transform_indices = @transform_13, window_bounds = array<i64: 4, 16>}, {pipeline_mode = #tpu.pipeline_mode<synchronous>, transform_indices = @transform_14, window_bounds = array<i64: 1, 16>}, {pipeline_mode = #tpu.pipeline_mode<synchronous>, transform_indices = @transform_15, window_bounds = array<i64: 1, 4>}, {pipeline_mode = #tpu.pipeline_mode<synchronous>, transform_indices = @transform_16, window_bounds = array<i64: 1, 4>}, {pipeline_mode = #tpu.pipeline_mode<synchronous>, transform_indices = @transform_17, window_bounds = array<i64: 64, 4>}, {pipeline_mode = #tpu.pipeline_mode<synchronous>, transform_indices = @transform_18, window_bounds = array<i64: 1, 4>}, {pipeline_mode = #tpu.pipeline_mode<synchronous>, transform_indices = @transform_19, window_bounds = array<i64: 1, 64>}, {pipeline_mode = #tpu.pipeline_mode<synchronous>, transform_indices = @transform_20, window_bounds = array<i64: 64, 32>}, {transform_indices = @transform_21, window_bounds = array<i64: 1, 8, 32>}]} {
    %c0 = arith.constant 0 : index
    %c0_0 = arith.constant 0 : index
    %c0_1 = arith.constant 0 : index
    %0 = vector.load %arg1[%c0, %c0_0, %c0_1] : memref<1x8x32xf32, #tpu.memory_space<vmem>>, vector<1x8x32xf32>
    %1 = vector.shape_cast %0 : vector<1x8x32xf32> to vector<8x32xf32>
    %c0_2 = arith.constant 0 : index
    %c0_3 = arith.constant 0 : index
    %2 = vector.load %arg2[%c0_2, %c0_3] : memref<1x32xf32, #tpu.memory_space<vmem>>, vector<1x32xf32>
    %c0_4 = arith.constant 0 : index
    %c0_5 = arith.constant 0 : index
    %3 = vector.load %arg3[%c0_4, %c0_5] : memref<1x32xf32, #tpu.memory_space<vmem>>, vector<1x32xf32>
    %c0_6 = arith.constant 0 : index
    %c0_7 = arith.constant 0 : index
    %4 = vector.load %arg4[%c0_6, %c0_7] : memref<32x64xf32, #tpu.memory_space<vmem>>, vector<32x64xf32>
    %cst = arith.constant dense<0.000000e+00> : vector<8x64xf32>
    %5 = tpu.matmul %1, %4, %cst {dimension_numbers = #tpu.dot_dimension_numbers<[1], [0], [0], [1], [0, 0, 1, 1], [], []>} : vector<8x32xf32>, vector<32x64xf32>, vector<8x64xf32> -> vector<8x64xf32>
    %c0_8 = arith.constant 0 : index
    %c0_9 = arith.constant 0 : index
    %6 = vector.load %arg5[%c0_8, %c0_9] : memref<32x64xf32, #tpu.memory_space<vmem>>, vector<32x64xf32>
    %cst_10 = arith.constant dense<0.000000e+00> : vector<8x64xf32>
    %7 = tpu.matmul %1, %6, %cst_10 {dimension_numbers = #tpu.dot_dimension_numbers<[1], [0], [0], [1], [0, 0, 1, 1], [], []>} : vector<8x32xf32>, vector<32x64xf32>, vector<8x64xf32> -> vector<8x64xf32>
    %c0_11 = arith.constant 0 : index
    %c0_12 = arith.constant 0 : index
    %8 = vector.load %arg6[%c0_11, %c0_12] : memref<32x16xf32, #tpu.memory_space<vmem>>, vector<32x16xf32>
    %cst_13 = arith.constant dense<0.000000e+00> : vector<8x16xf32>
    %9 = tpu.matmul %1, %8, %cst_13 {dimension_numbers = #tpu.dot_dimension_numbers<[1], [0], [0], [1], [0, 0, 1, 1], [], []>} : vector<8x32xf32>, vector<32x16xf32>, vector<8x16xf32> -> vector<8x16xf32>
    %c0_14 = arith.constant 0 : index
    %c0_15 = arith.constant 0 : index
    %10 = vector.load %arg7[%c0_14, %c0_15] : memref<32x16xf32, #tpu.memory_space<vmem>>, vector<32x16xf32>
    %cst_16 = arith.constant dense<0.000000e+00> : vector<8x16xf32>
    %11 = tpu.matmul %1, %10, %cst_16 {dimension_numbers = #tpu.dot_dimension_numbers<[1], [0], [0], [1], [0, 0, 1, 1], [], []>} : vector<8x32xf32>, vector<32x16xf32>, vector<8x16xf32> -> vector<8x16xf32>
    %c0_17 = arith.constant 0 : index
    %c0_18 = arith.constant 0 : index
    %12 = vector.load %arg8[%c0_17, %c0_18] : memref<32x4xf32, #tpu.memory_space<vmem>>, vector<32x4xf32>
    %cst_19 = arith.constant dense<0.000000e+00> : vector<8x4xf32>
    %13 = tpu.matmul %1, %12, %cst_19 {dimension_numbers = #tpu.dot_dimension_numbers<[1], [0], [0], [1], [0, 0, 1, 1], [], []>} : vector<8x32xf32>, vector<32x4xf32>, vector<8x4xf32> -> vector<8x4xf32>
    %c0_20 = arith.constant 0 : index
    %c0_21 = arith.constant 0 : index
    %14 = vector.load %arg9[%c0_20, %c0_21] : memref<32x4xf32, #tpu.memory_space<vmem>>, vector<32x4xf32>
    %cst_22 = arith.constant dense<0.000000e+00> : vector<8x4xf32>
    %15 = tpu.matmul %1, %14, %cst_22 {dimension_numbers = #tpu.dot_dimension_numbers<[1], [0], [0], [1], [0, 0, 1, 1], [], []>} : vector<8x32xf32>, vector<32x4xf32>, vector<8x4xf32> -> vector<8x4xf32>
    %16 = tpu.iota {dimensions = array<i32: 0>} : vector<8x8xi32>
    %17 = tpu.iota {dimensions = array<i32: 1>} : vector<8x8xi32>
    %cst_23 = arith.constant 0.000000e+00 : f32
    %18 = vector.broadcast %cst_23 : f32 to vector<8x64xf32>
    %c0_24 = arith.constant 0 : index
    %c0_25 = arith.constant 0 : index
    %19 = vector.load %arg11[%c0_24, %c0_25] : memref<1x64xf32, #tpu.memory_space<vmem>>, vector<1x64xf32>
    %20 = vector.broadcast %19 : vector<1x64xf32> to vector<8x64xf32>
    %21 = arith.addf %18, %20 : vector<8x64xf32>
    %22 = arith.subi %16, %17 : vector<8x8xi32>
    %c3_i32 = arith.constant 3 : i32
    %23 = vector.broadcast %c3_i32 : i32 to vector<8x8xi32>
    %24 = arith.cmpi eq, %22, %23 : vector<8x8xi32>
    %25 = arith.extui %24 : vector<8x8xi1> to vector<8x8xi32>
    %26 = arith.sitofp %25 : vector<8x8xi32> to vector<8x8xf32>
    %cst_26 = arith.constant dense<0.000000e+00> : vector<8x64xf32>
    %27 = tpu.matmul %26, %7, %cst_26 {dimension_numbers = #tpu.dot_dimension_numbers<[1], [0], [0], [1], [0, 0, 1, 1], [], []>} : vector<8x8xf32>, vector<8x64xf32>, vector<8x64xf32> -> vector<8x64xf32>
    %c0_27 = arith.constant 0 : index
    %c0_28 = arith.constant 0 : index
    %28 = vector.load %arg10[%c0_27, %c0_28] : memref<4x64xf32, #tpu.memory_space<vmem>>, vector<1x64xf32>
    %29 = vector.broadcast %28 : vector<1x64xf32> to vector<8x64xf32>
    %30 = arith.mulf %27, %29 : vector<8x64xf32>
    %31 = arith.addf %21, %30 : vector<8x64xf32>
    %32 = arith.subi %16, %17 : vector<8x8xi32>
    %c2_i32 = arith.constant 2 : i32
    %33 = vector.broadcast %c2_i32 : i32 to vector<8x8xi32>
    %34 = arith.cmpi eq, %32, %33 : vector<8x8xi32>
    %35 = arith.extui %34 : vector<8x8xi1> to vector<8x8xi32>
    %36 = arith.sitofp %35 : vector<8x8xi32> to vector<8x8xf32>
    %cst_29 = arith.constant dense<0.000000e+00> : vector<8x64xf32>
    %37 = tpu.matmul %36, %7, %cst_29 {dimension_numbers = #tpu.dot_dimension_numbers<[1], [0], [0], [1], [0, 0, 1, 1], [], []>} : vector<8x8xf32>, vector<8x64xf32>, vector<8x64xf32> -> vector<8x64xf32>
    %c1 = arith.constant 1 : index
    %c0_30 = arith.constant 0 : index
    %38 = vector.load %arg10[%c1, %c0_30] : memref<4x64xf32, #tpu.memory_space<vmem>>, vector<1x64xf32>
    %39 = vector.broadcast %38 : vector<1x64xf32> to vector<8x64xf32>
    %40 = arith.mulf %37, %39 : vector<8x64xf32>
    %41 = arith.addf %31, %40 : vector<8x64xf32>
    %42 = arith.subi %16, %17 : vector<8x8xi32>
    %c1_i32 = arith.constant 1 : i32
    %43 = vector.broadcast %c1_i32 : i32 to vector<8x8xi32>
    %44 = arith.cmpi eq, %42, %43 : vector<8x8xi32>
    %45 = arith.extui %44 : vector<8x8xi1> to vector<8x8xi32>
    %46 = arith.sitofp %45 : vector<8x8xi32> to vector<8x8xf32>
    %cst_31 = arith.constant dense<0.000000e+00> : vector<8x64xf32>
    %47 = tpu.matmul %46, %7, %cst_31 {dimension_numbers = #tpu.dot_dimension_numbers<[1], [0], [0], [1], [0, 0, 1, 1], [], []>} : vector<8x8xf32>, vector<8x64xf32>, vector<8x64xf32> -> vector<8x64xf32>
    %c2 = arith.constant 2 : index
    %c0_32 = arith.constant 0 : index
    %48 = vector.load %arg10[%c2, %c0_32] : memref<4x64xf32, #tpu.memory_space<vmem>>, vector<1x64xf32>
    %49 = vector.broadcast %48 : vector<1x64xf32> to vector<8x64xf32>
    %50 = arith.mulf %47, %49 : vector<8x64xf32>
    %51 = arith.addf %41, %50 : vector<8x64xf32>
    %c3 = arith.constant 3 : index
    %c0_33 = arith.constant 0 : index
    %52 = vector.load %arg10[%c3, %c0_33] : memref<4x64xf32, #tpu.memory_space<vmem>>, vector<1x64xf32>
    %53 = vector.broadcast %52 : vector<1x64xf32> to vector<8x64xf32>
    %54 = arith.mulf %7, %53 : vector<8x64xf32>
    %55 = arith.addf %51, %54 : vector<8x64xf32>
    %56 = arith.negf %55 : vector<8x64xf32>
    %57 = math.exp %56 : vector<8x64xf32>
    %cst_34 = arith.constant 1.000000e+00 : f32
    %58 = vector.broadcast %cst_34 : f32 to vector<8x64xf32>
    %59 = arith.addf %58, %57 : vector<8x64xf32>
    %60 = arith.divf %58, %59 : vector<8x64xf32>
    %61 = arith.mulf %55, %60 : vector<8x64xf32>
    %cst_35 = arith.constant 0.000000e+00 : f32
    %62 = vector.broadcast %cst_35 : f32 to vector<8x16xf32>
    %c0_36 = arith.constant 0 : index
    %c0_37 = arith.constant 0 : index
    %63 = vector.load %arg13[%c0_36, %c0_37] : memref<1x16xf32, #tpu.memory_space<vmem>>, vector<1x16xf32>
    %64 = vector.broadcast %63 : vector<1x16xf32> to vector<8x16xf32>
    %65 = arith.addf %62, %64 : vector<8x16xf32>
    %66 = arith.subi %16, %17 : vector<8x8xi32>
    %c3_i32_38 = arith.constant 3 : i32
    %67 = vector.broadcast %c3_i32_38 : i32 to vector<8x8xi32>
    %68 = arith.cmpi eq, %66, %67 : vector<8x8xi32>
    %69 = arith.extui %68 : vector<8x8xi1> to vector<8x8xi32>
    %70 = arith.sitofp %69 : vector<8x8xi32> to vector<8x8xf32>
    %cst_39 = arith.constant dense<0.000000e+00> : vector<8x16xf32>
    %71 = tpu.matmul %70, %9, %cst_39 {dimension_numbers = #tpu.dot_dimension_numbers<[1], [0], [0], [1], [0, 0, 1, 1], [], []>} : vector<8x8xf32>, vector<8x16xf32>, vector<8x16xf32> -> vector<8x16xf32>
    %c0_40 = arith.constant 0 : index
    %c0_41 = arith.constant 0 : index
    %72 = vector.load %arg12[%c0_40, %c0_41] : memref<4x16xf32, #tpu.memory_space<vmem>>, vector<1x16xf32>
    %73 = vector.broadcast %72 : vector<1x16xf32> to vector<8x16xf32>
    %74 = arith.mulf %71, %73 : vector<8x16xf32>
    %75 = arith.addf %65, %74 : vector<8x16xf32>
    %76 = arith.subi %16, %17 : vector<8x8xi32>
    %c2_i32_42 = arith.constant 2 : i32
    %77 = vector.broadcast %c2_i32_42 : i32 to vector<8x8xi32>
    %78 = arith.cmpi eq, %76, %77 : vector<8x8xi32>
    %79 = arith.extui %78 : vector<8x8xi1> to vector<8x8xi32>
    %80 = arith.sitofp %79 : vector<8x8xi32> to vector<8x8xf32>
    %cst_43 = arith.constant dense<0.000000e+00> : vector<8x16xf32>
    %81 = tpu.matmul %80, %9, %cst_43 {dimension_numbers = #tpu.dot_dimension_numbers<[1], [0], [0], [1], [0, 0, 1, 1], [], []>} : vector<8x8xf32>, vector<8x16xf32>, vector<8x16xf32> -> vector<8x16xf32>
    %c1_44 = arith.constant 1 : index
    %c0_45 = arith.constant 0 : index
    %82 = vector.load %arg12[%c1_44, %c0_45] : memref<4x16xf32, #tpu.memory_space<vmem>>, vector<1x16xf32>
    %83 = vector.broadcast %82 : vector<1x16xf32> to vector<8x16xf32>
    %84 = arith.mulf %81, %83 : vector<8x16xf32>
    %85 = arith.addf %75, %84 : vector<8x16xf32>
    %86 = arith.subi %16, %17 : vector<8x8xi32>
    %c1_i32_46 = arith.constant 1 : i32
    %87 = vector.broadcast %c1_i32_46 : i32 to vector<8x8xi32>
    %88 = arith.cmpi eq, %86, %87 : vector<8x8xi32>
    %89 = arith.extui %88 : vector<8x8xi1> to vector<8x8xi32>
    %90 = arith.sitofp %89 : vector<8x8xi32> to vector<8x8xf32>
    %cst_47 = arith.constant dense<0.000000e+00> : vector<8x16xf32>
    %91 = tpu.matmul %90, %9, %cst_47 {dimension_numbers = #tpu.dot_dimension_numbers<[1], [0], [0], [1], [0, 0, 1, 1], [], []>} : vector<8x8xf32>, vector<8x16xf32>, vector<8x16xf32> -> vector<8x16xf32>
    %c2_48 = arith.constant 2 : index
    %c0_49 = arith.constant 0 : index
    %92 = vector.load %arg12[%c2_48, %c0_49] : memref<4x16xf32, #tpu.memory_space<vmem>>, vector<1x16xf32>
    %93 = vector.broadcast %92 : vector<1x16xf32> to vector<8x16xf32>
    %94 = arith.mulf %91, %93 : vector<8x16xf32>
    %95 = arith.addf %85, %94 : vector<8x16xf32>
    %c3_50 = arith.constant 3 : index
    %c0_51 = arith.constant 0 : index
    %96 = vector.load %arg12[%c3_50, %c0_51] : memref<4x16xf32, #tpu.memory_space<vmem>>, vector<1x16xf32>
    %97 = vector.broadcast %96 : vector<1x16xf32> to vector<8x16xf32>
    %98 = arith.mulf %9, %97 : vector<8x16xf32>
    %99 = arith.addf %95, %98 : vector<8x16xf32>
    %100 = arith.negf %99 : vector<8x16xf32>
    %101 = math.exp %100 : vector<8x16xf32>
    %cst_52 = arith.constant 1.000000e+00 : f32
    %102 = vector.broadcast %cst_52 : f32 to vector<8x16xf32>
    %103 = arith.addf %102, %101 : vector<8x16xf32>
    %104 = arith.divf %102, %103 : vector<8x16xf32>
    %105 = arith.mulf %99, %104 : vector<8x16xf32>
    %cst_53 = arith.constant 0.000000e+00 : f32
    %106 = vector.broadcast %cst_53 : f32 to vector<8x16xf32>
    %c0_54 = arith.constant 0 : index
    %c0_55 = arith.constant 0 : index
    %107 = vector.load %arg15[%c0_54, %c0_55] : memref<1x16xf32, #tpu.memory_space<vmem>>, vector<1x16xf32>
    %108 = vector.broadcast %107 : vector<1x16xf32> to vector<8x16xf32>
    %109 = arith.addf %106, %108 : vector<8x16xf32>
    %110 = arith.subi %16, %17 : vector<8x8xi32>
    %c3_i32_56 = arith.constant 3 : i32
    %111 = vector.broadcast %c3_i32_56 : i32 to vector<8x8xi32>
    %112 = arith.cmpi eq, %110, %111 : vector<8x8xi32>
    %113 = arith.extui %112 : vector<8x8xi1> to vector<8x8xi32>
    %114 = arith.sitofp %113 : vector<8x8xi32> to vector<8x8xf32>
    %cst_57 = arith.constant dense<0.000000e+00> : vector<8x16xf32>
    %115 = tpu.matmul %114, %11, %cst_57 {dimension_numbers = #tpu.dot_dimension_numbers<[1], [0], [0], [1], [0, 0, 1, 1], [], []>} : vector<8x8xf32>, vector<8x16xf32>, vector<8x16xf32> -> vector<8x16xf32>
    %c0_58 = arith.constant 0 : index
    %c0_59 = arith.constant 0 : index
    %116 = vector.load %arg14[%c0_58, %c0_59] : memref<4x16xf32, #tpu.memory_space<vmem>>, vector<1x16xf32>
    %117 = vector.broadcast %116 : vector<1x16xf32> to vector<8x16xf32>
    %118 = arith.mulf %115, %117 : vector<8x16xf32>
    %119 = arith.addf %109, %118 : vector<8x16xf32>
    %120 = arith.subi %16, %17 : vector<8x8xi32>
    %c2_i32_60 = arith.constant 2 : i32
    %121 = vector.broadcast %c2_i32_60 : i32 to vector<8x8xi32>
    %122 = arith.cmpi eq, %120, %121 : vector<8x8xi32>
    %123 = arith.extui %122 : vector<8x8xi1> to vector<8x8xi32>
    %124 = arith.sitofp %123 : vector<8x8xi32> to vector<8x8xf32>
    %cst_61 = arith.constant dense<0.000000e+00> : vector<8x16xf32>
    %125 = tpu.matmul %124, %11, %cst_61 {dimension_numbers = #tpu.dot_dimension_numbers<[1], [0], [0], [1], [0, 0, 1, 1], [], []>} : vector<8x8xf32>, vector<8x16xf32>, vector<8x16xf32> -> vector<8x16xf32>
    %c1_62 = arith.constant 1 : index
    %c0_63 = arith.constant 0 : index
    %126 = vector.load %arg14[%c1_62, %c0_63] : memref<4x16xf32, #tpu.memory_space<vmem>>, vector<1x16xf32>
    %127 = vector.broadcast %126 : vector<1x16xf32> to vector<8x16xf32>
    %128 = arith.mulf %125, %127 : vector<8x16xf32>
    %129 = arith.addf %119, %128 : vector<8x16xf32>
    %130 = arith.subi %16, %17 : vector<8x8xi32>
    %c1_i32_64 = arith.constant 1 : i32
    %131 = vector.broadcast %c1_i32_64 : i32 to vector<8x8xi32>
    %132 = arith.cmpi eq, %130, %131 : vector<8x8xi32>
    %133 = arith.extui %132 : vector<8x8xi1> to vector<8x8xi32>
    %134 = arith.sitofp %133 : vector<8x8xi32> to vector<8x8xf32>
    %cst_65 = arith.constant dense<0.000000e+00> : vector<8x16xf32>
    %135 = tpu.matmul %134, %11, %cst_65 {dimension_numbers = #tpu.dot_dimension_numbers<[1], [0], [0], [1], [0, 0, 1, 1], [], []>} : vector<8x8xf32>, vector<8x16xf32>, vector<8x16xf32> -> vector<8x16xf32>
    %c2_66 = arith.constant 2 : index
    %c0_67 = arith.constant 0 : index
    %136 = vector.load %arg14[%c2_66, %c0_67] : memref<4x16xf32, #tpu.memory_space<vmem>>, vector<1x16xf32>
    %137 = vector.broadcast %136 : vector<1x16xf32> to vector<8x16xf32>
    %138 = arith.mulf %135, %137 : vector<8x16xf32>
    %139 = arith.addf %129, %138 : vector<8x16xf32>
    %c3_68 = arith.constant 3 : index
    %c0_69 = arith.constant 0 : index
    %140 = vector.load %arg14[%c3_68, %c0_69] : memref<4x16xf32, #tpu.memory_space<vmem>>, vector<1x16xf32>
    %141 = vector.broadcast %140 : vector<1x16xf32> to vector<8x16xf32>
    %142 = arith.mulf %11, %141 : vector<8x16xf32>
    %143 = arith.addf %139, %142 : vector<8x16xf32>
    %144 = arith.negf %143 : vector<8x16xf32>
    %145 = math.exp %144 : vector<8x16xf32>
    %cst_70 = arith.constant 1.000000e+00 : f32
    %146 = vector.broadcast %cst_70 : f32 to vector<8x16xf32>
    %147 = arith.addf %146, %145 : vector<8x16xf32>
    %148 = arith.divf %146, %147 : vector<8x16xf32>
    %149 = arith.mulf %143, %148 : vector<8x16xf32>
    %c0_71 = arith.constant 0 : index
    %c0_72 = arith.constant 0 : index
    %150 = vector.load %arg16[%c0_71, %c0_72] : memref<1x4xf32, #tpu.memory_space<vmem>>, vector<1x4xf32>
    %c0_73 = arith.constant 0 : index
    %c0_74 = arith.constant 0 : index
    %151 = vector.load %arg17[%c0_73, %c0_74] : memref<1x4xf32, #tpu.memory_space<vmem>>, vector<1x4xf32>
    %152 = vector.broadcast %150 : vector<1x4xf32> to vector<8x4xf32>
    %153 = arith.addf %13, %152 : vector<8x4xf32>
    %cst_75 = arith.constant 0.000000e+00 : f32
    %154 = vector.broadcast %cst_75 : f32 to vector<8x4xf32>
    %155 = arith.maximumf %153, %154 : vector<8x4xf32>
    %156 = math.absf %153 : vector<8x4xf32>
    %cst_76 = arith.constant 0.000000e+00 : f32
    %157 = vector.broadcast %cst_76 : f32 to vector<8x4xf32>
    %158 = arith.subf %157, %156 : vector<8x4xf32>
    %159 = math.exp %158 : vector<8x4xf32>
    %cst_77 = arith.constant 1.000000e+00 : f32
    %160 = vector.broadcast %cst_77 : f32 to vector<8x4xf32>
    %161 = arith.addf %160, %159 : vector<8x4xf32>
    %162 = math.log %161 : vector<8x4xf32>
    %163 = arith.addf %155, %162 : vector<8x4xf32>
    %164 = vector.broadcast %150 : vector<1x4xf32> to vector<8x4xf32>
    %165 = arith.addf %15, %164 : vector<8x4xf32>
    %cst_78 = arith.constant 0.000000e+00 : f32
    %166 = vector.broadcast %cst_78 : f32 to vector<8x4xf32>
    %167 = arith.maximumf %165, %166 : vector<8x4xf32>
    %168 = math.absf %165 : vector<8x4xf32>
    %cst_79 = arith.constant 0.000000e+00 : f32
    %169 = vector.broadcast %cst_79 : f32 to vector<8x4xf32>
    %170 = arith.subf %169, %168 : vector<8x4xf32>
    %171 = math.exp %170 : vector<8x4xf32>
    %cst_80 = arith.constant 1.000000e+00 : f32
    %172 = vector.broadcast %cst_80 : f32 to vector<8x4xf32>
    %173 = arith.addf %172, %171 : vector<8x4xf32>
    %174 = math.log %173 : vector<8x4xf32>
    %175 = arith.addf %167, %174 : vector<8x4xf32>
    %176 = vector.broadcast %151 : vector<1x4xf32> to vector<8x4xf32>
    %177 = arith.mulf %163, %176 : vector<8x4xf32>
    %178 = vector.broadcast %151 : vector<1x4xf32> to vector<8x4xf32>
    %179 = arith.mulf %175, %178 : vector<8x4xf32>
    %180 = arith.cmpi sge, %16, %17 : vector<8x8xi32>
    %181 = arith.extui %180 : vector<8x8xi1> to vector<8x8xi32>
    %182 = arith.sitofp %181 : vector<8x8xi32> to vector<8x8xf32>
    %183 = arith.cmpi sle, %16, %17 : vector<8x8xi32>
    %184 = arith.extui %183 : vector<8x8xi1> to vector<8x8xi32>
    %185 = arith.sitofp %184 : vector<8x8xi32> to vector<8x8xf32>
    %cst_81 = arith.constant dense<0.000000e+00> : vector<8x4xf32>
    %186 = tpu.matmul %182, %177, %cst_81 {dimension_numbers = #tpu.dot_dimension_numbers<[1], [0], [0], [1], [0, 0, 1, 1], [], []>} : vector<8x8xf32>, vector<8x4xf32>, vector<8x4xf32> -> vector<8x4xf32>
    %cst_82 = arith.constant dense<0.000000e+00> : vector<8x4xf32>
    %187 = tpu.matmul %182, %179, %cst_82 {dimension_numbers = #tpu.dot_dimension_numbers<[1], [0], [0], [1], [0, 0, 1, 1], [], []>} : vector<8x8xf32>, vector<8x4xf32>, vector<8x4xf32> -> vector<8x4xf32>
    %188 = arith.subf %187, %179 : vector<8x4xf32>
    %cst_83 = arith.constant dense<0.000000e+00> : vector<8x8xf32>
    %189 = tpu.matmul %149, %105, %cst_83 {dimension_numbers = #tpu.dot_dimension_numbers<[1], [1], [0], [0], [0, 0, 1, 0], [], []>} : vector<8x16xf32>, vector<8x16xf32>, vector<8x8xf32> -> vector<8x8xf32>
    %190 = tpu.iota {dimensions = array<i32: 0>} : vector<4x64xi32>
    %191 = tpu.iota {dimensions = array<i32: 1>} : vector<4x64xi32>
    %c16_i32 = arith.constant 16 : i32
    %192 = vector.broadcast %c16_i32 : i32 to vector<4x64xi32>
    %193 = arith.muli %190, %192 : vector<4x64xi32>
    %194 = arith.cmpi sge, %191, %193 : vector<4x64xi32>
    %c1_i32_84 = arith.constant 1 : i32
    %195 = vector.broadcast %c1_i32_84 : i32 to vector<4x64xi32>
    %196 = arith.addi %190, %195 : vector<4x64xi32>
    %c16_i32_85 = arith.constant 16 : i32
    %197 = vector.broadcast %c16_i32_85 : i32 to vector<4x64xi32>
    %198 = arith.muli %196, %197 : vector<4x64xi32>
    %199 = arith.cmpi slt, %191, %198 : vector<4x64xi32>
    %200 = arith.andi %194, %199 : vector<4x64xi1>
    %201 = arith.extui %200 : vector<4x64xi1> to vector<4x64xi32>
    %202 = arith.sitofp %201 : vector<4x64xi32> to vector<4x64xf32>
    %203 = math.exp %186 : vector<8x4xf32>
    %cst_86 = arith.constant dense<0.000000e+00> : vector<8x64xf32>
    %204 = tpu.matmul %203, %202, %cst_86 {dimension_numbers = #tpu.dot_dimension_numbers<[1], [0], [0], [1], [0, 0, 1, 1], [], []>} : vector<8x4xf32>, vector<4x64xf32>, vector<8x64xf32> -> vector<8x64xf32>
    %205 = arith.mulf %182, %189 : vector<8x8xf32>
    %cst_87 = arith.constant 0.000000e+00 : f32
    %206 = vector.broadcast %cst_87 : f32 to vector<8x4xf32>
    %207 = arith.subf %206, %186 : vector<8x4xf32>
    %208 = math.exp %207 : vector<8x4xf32>
    %209 = arith.mulf %208, %163 : vector<8x4xf32>
    %cst_88 = arith.constant dense<0.000000e+00> : vector<8x64xf32>
    %210 = tpu.matmul %209, %202, %cst_88 {dimension_numbers = #tpu.dot_dimension_numbers<[1], [0], [0], [1], [0, 0, 1, 1], [], []>} : vector<8x4xf32>, vector<4x64xf32>, vector<8x64xf32> -> vector<8x64xf32>
    %211 = arith.mulf %210, %61 : vector<8x64xf32>
    %cst_89 = arith.constant dense<0.000000e+00> : vector<8x64xf32>
    %212 = tpu.matmul %205, %211, %cst_89 {dimension_numbers = #tpu.dot_dimension_numbers<[1], [0], [0], [1], [0, 0, 1, 1], [], []>} : vector<8x8xf32>, vector<8x64xf32>, vector<8x64xf32> -> vector<8x64xf32>
    %213 = arith.mulf %204, %212 : vector<8x64xf32>
    %cst_90 = arith.constant 0.000000e+00 : f32
    %214 = vector.broadcast %cst_90 : f32 to vector<8x4xf32>
    %215 = arith.subf %214, %188 : vector<8x4xf32>
    %216 = math.exp %215 : vector<8x4xf32>
    %cst_91 = arith.constant dense<0.000000e+00> : vector<8x64xf32>
    %217 = tpu.matmul %216, %202, %cst_91 {dimension_numbers = #tpu.dot_dimension_numbers<[1], [0], [0], [1], [0, 0, 1, 1], [], []>} : vector<8x4xf32>, vector<4x64xf32>, vector<8x64xf32> -> vector<8x64xf32>
    %218 = arith.mulf %185, %189 : vector<8x8xf32>
    %219 = math.exp %188 : vector<8x4xf32>
    %220 = arith.mulf %219, %175 : vector<8x4xf32>
    %cst_92 = arith.constant dense<0.000000e+00> : vector<8x64xf32>
    %221 = tpu.matmul %220, %202, %cst_92 {dimension_numbers = #tpu.dot_dimension_numbers<[1], [0], [0], [1], [0, 0, 1, 1], [], []>} : vector<8x4xf32>, vector<4x64xf32>, vector<8x64xf32> -> vector<8x64xf32>
    %222 = arith.mulf %221, %61 : vector<8x64xf32>
    %cst_93 = arith.constant dense<0.000000e+00> : vector<8x64xf32>
    %223 = tpu.matmul %218, %222, %cst_93 {dimension_numbers = #tpu.dot_dimension_numbers<[1], [0], [0], [1], [0, 0, 1, 1], [], []>} : vector<8x8xf32>, vector<8x64xf32>, vector<8x64xf32> -> vector<8x64xf32>
    %224 = arith.mulf %217, %223 : vector<8x64xf32>
    %225 = arith.subi %16, %17 : vector<8x8xi32>
    %c1_i32_94 = arith.constant 1 : i32
    %226 = vector.broadcast %c1_i32_94 : i32 to vector<8x8xi32>
    %227 = arith.cmpi eq, %225, %226 : vector<8x8xi32>
    %228 = arith.extui %227 : vector<8x8xi1> to vector<8x8xi32>
    %229 = arith.sitofp %228 : vector<8x8xi32> to vector<8x8xf32>
    %cst_95 = arith.constant dense<0.000000e+00> : vector<8x64xf32>
    %230 = tpu.matmul %229, %213, %cst_95 {dimension_numbers = #tpu.dot_dimension_numbers<[1], [0], [0], [1], [0, 0, 1, 1], [], []>} : vector<8x8xf32>, vector<8x64xf32>, vector<8x64xf32> -> vector<8x64xf32>
    %231 = arith.subi %16, %17 : vector<8x8xi32>
    %c-1_i32 = arith.constant -1 : i32
    %232 = vector.broadcast %c-1_i32 : i32 to vector<8x8xi32>
    %233 = arith.cmpi eq, %231, %232 : vector<8x8xi32>
    %234 = arith.extui %233 : vector<8x8xi1> to vector<8x8xi32>
    %235 = arith.sitofp %234 : vector<8x8xi32> to vector<8x8xf32>
    %cst_96 = arith.constant dense<0.000000e+00> : vector<8x64xf32>
    %236 = tpu.matmul %235, %224, %cst_96 {dimension_numbers = #tpu.dot_dimension_numbers<[1], [0], [0], [1], [0, 0, 1, 1], [], []>} : vector<8x8xf32>, vector<8x64xf32>, vector<8x64xf32> -> vector<8x64xf32>
    %c0_97 = arith.constant 0 : index
    %c0_98 = arith.constant 0 : index
    %237 = vector.load %arg18[%c0_97, %c0_98] : memref<64x4xf32, #tpu.memory_space<vmem>>, vector<64x4xf32>
    %cst_99 = arith.constant dense<0.000000e+00> : vector<8x4xf32>
    %238 = tpu.matmul %61, %237, %cst_99 {dimension_numbers = #tpu.dot_dimension_numbers<[1], [0], [0], [1], [0, 0, 1, 1], [], []>} : vector<8x64xf32>, vector<64x4xf32>, vector<8x4xf32> -> vector<8x4xf32>
    %c0_100 = arith.constant 0 : index
    %c0_101 = arith.constant 0 : index
    %239 = vector.load %arg19[%c0_100, %c0_101] : memref<1x4xf32, #tpu.memory_space<vmem>>, vector<1x4xf32>
    %240 = vector.broadcast %239 : vector<1x4xf32> to vector<8x4xf32>
    %241 = arith.addf %238, %240 : vector<8x4xf32>
    %242 = arith.addf %230, %236 : vector<8x64xf32>
    %cst_102 = arith.constant dense<0.000000e+00> : vector<8x64xf32>
    %243 = tpu.matmul %241, %202, %cst_102 {dimension_numbers = #tpu.dot_dimension_numbers<[1], [0], [0], [1], [0, 0, 1, 1], [], []>} : vector<8x4xf32>, vector<4x64xf32>, vector<8x64xf32> -> vector<8x64xf32>
    %244 = arith.mulf %61, %243 : vector<8x64xf32>
    %245 = arith.addf %242, %244 : vector<8x64xf32>
    %246 = arith.negf %5 : vector<8x64xf32>
    %247 = math.exp %246 : vector<8x64xf32>
    %cst_103 = arith.constant 1.000000e+00 : f32
    %248 = vector.broadcast %cst_103 : f32 to vector<8x64xf32>
    %249 = arith.addf %248, %247 : vector<8x64xf32>
    %250 = arith.divf %248, %249 : vector<8x64xf32>
    %251 = arith.mulf %5, %250 : vector<8x64xf32>
    %252 = arith.mulf %245, %251 : vector<8x64xf32>
    %253 = arith.mulf %252, %252 : vector<8x64xf32>
    %cst_104 = arith.constant dense<0.000000e+00> : vector<8xf32>
    %254 = vector.multi_reduction <add>, %253, %cst_104 [1] : vector<8x64xf32> to vector<8xf32>
    %255 = vector.shape_cast %254 : vector<8xf32> to vector<8x1xf32>
    %cst_105 = arith.constant 6.400000e+01 : f32
    %256 = vector.broadcast %cst_105 : f32 to vector<8x1xf32>
    %257 = arith.divf %255, %256 : vector<8x1xf32>
    %cst_106 = arith.constant 9.99999974E-6 : f32
    %258 = vector.broadcast %cst_106 : f32 to vector<8x1xf32>
    %259 = arith.addf %257, %258 : vector<8x1xf32>
    %260 = math.rsqrt %259 : vector<8x1xf32>
    %261 = vector.broadcast %260 : vector<8x1xf32> to vector<8x64xf32>
    %262 = arith.mulf %252, %261 : vector<8x64xf32>
    %c0_107 = arith.constant 0 : index
    %c0_108 = arith.constant 0 : index
    %263 = vector.load %arg20[%c0_107, %c0_108] : memref<1x64xf32, #tpu.memory_space<vmem>>, vector<1x64xf32>
    %264 = vector.broadcast %263 : vector<1x64xf32> to vector<8x64xf32>
    %265 = arith.mulf %262, %264 : vector<8x64xf32>
    %c0_109 = arith.constant 0 : index
    %c0_110 = arith.constant 0 : index
    %266 = vector.load %arg21[%c0_109, %c0_110] : memref<64x32xf32, #tpu.memory_space<vmem>>, vector<64x32xf32>
    %cst_111 = arith.constant dense<0.000000e+00> : vector<8x32xf32>
    %267 = tpu.matmul %265, %266, %cst_111 {dimension_numbers = #tpu.dot_dimension_numbers<[1], [0], [0], [1], [0, 0, 1, 1], [], []>} : vector<8x64xf32>, vector<64x32xf32>, vector<8x32xf32> -> vector<8x32xf32>
    %268 = arith.addf %267, %1 : vector<8x32xf32>
    %cst_112 = arith.constant dense<0.000000e+00> : vector<8xf32>
    %269 = vector.multi_reduction <add>, %268, %cst_112 [1] : vector<8x32xf32> to vector<8xf32>
    %270 = vector.shape_cast %269 : vector<8xf32> to vector<8x1xf32>
    %cst_113 = arith.constant 3.200000e+01 : f32
    %271 = vector.broadcast %cst_113 : f32 to vector<8x1xf32>
    %272 = arith.divf %270, %271 : vector<8x1xf32>
    %273 = vector.broadcast %272 : vector<8x1xf32> to vector<8x32xf32>
    %274 = arith.subf %268, %273 : vector<8x32xf32>
    %275 = arith.mulf %274, %274 : vector<8x32xf32>
    %cst_114 = arith.constant dense<0.000000e+00> : vector<8xf32>
    %276 = vector.multi_reduction <add>, %275, %cst_114 [1] : vector<8x32xf32> to vector<8xf32>
    %277 = vector.shape_cast %276 : vector<8xf32> to vector<8x1xf32>
    %cst_115 = arith.constant 3.200000e+01 : f32
    %278 = vector.broadcast %cst_115 : f32 to vector<8x1xf32>
    %279 = arith.divf %277, %278 : vector<8x1xf32>
    %280 = vector.broadcast %272 : vector<8x1xf32> to vector<8x32xf32>
    %281 = arith.subf %268, %280 : vector<8x32xf32>
    %cst_116 = arith.constant 9.99999974E-6 : f32
    %282 = vector.broadcast %cst_116 : f32 to vector<8x1xf32>
    %283 = arith.addf %279, %282 : vector<8x1xf32>
    %284 = math.rsqrt %283 : vector<8x1xf32>
    %285 = vector.broadcast %284 : vector<8x1xf32> to vector<8x32xf32>
    %286 = arith.mulf %281, %285 : vector<8x32xf32>
    %287 = vector.broadcast %2 : vector<1x32xf32> to vector<8x32xf32>
    %288 = arith.mulf %286, %287 : vector<8x32xf32>
    %289 = vector.broadcast %3 : vector<1x32xf32> to vector<8x32xf32>
    %290 = arith.addf %288, %289 : vector<8x32xf32>
    %c0_117 = arith.constant 0 : index
    %c0_118 = arith.constant 0 : index
    %c0_119 = arith.constant 0 : index
    %291 = vector.load %arg22[%c0_117, %c0_118, %c0_119] : memref<1x8x32xf32, #tpu.memory_space<vmem>>, vector<1x8x32xf32>
    %292 = vector.shape_cast %291 : vector<1x8x32xf32> to vector<8x32xf32>
    %293 = vector.shape_cast %290 : vector<8x32xf32> to vector<1x8x32xf32>
    tpu.vector_store %arg22[%c0_117, %c0_118, %c0_119], %293 {strides = array<i32>} : memref<1x8x32xf32, #tpu.memory_space<vmem>>, vector<1x8x32xf32>,
    return
  }
  func.func @transform_0(%arg0: i32) -> (i32, i32, i32) {
    %c0_i32 = arith.constant 0 : i32
    %c0_i32_0 = arith.constant 0 : i32
    %c0_i32_1 = arith.constant 0 : i32
    return %arg0, %c0_i32, %c0_i32_0 : i32, i32, i32
  }
  func.func @transform_1(%arg0: i32) -> (i32, i32) {
    %c0_i32 = arith.constant 0 : i32
    %c0_i32_0 = arith.constant 0 : i32
    %c0_i32_1 = arith.constant 0 : i32
    return %c0_i32, %c0_i32_0 : i32, i32
  }
  func.func @transform_2(%arg0: i32) -> (i32, i32) {
    %c0_i32 = arith.constant 0 : i32
    %c0_i32_0 = arith.constant 0 : i32
    %c0_i32_1 = arith.constant 0 : i32
    return %c0_i32, %c0_i32_0 : i32, i32
  }
  func.func @transform_3(%arg0: i32) -> (i32, i32) {
    %c0_i32 = arith.constant 0 : i32
    %c0_i32_0 = arith.constant 0 : i32
    %c0_i32_1 = arith.constant 0 : i32
    return %c0_i32, %c0_i32_0 : i32, i32
  }
  func.func @transform_4(%arg0: i32) -> (i32, i32) {
    %c0_i32 = arith.constant 0 : i32
    %c0_i32_0 = arith.constant 0 : i32
    %c0_i32_1 = arith.constant 0 : i32
    return %c0_i32, %c0_i32_0 : i32, i32
  }
  func.func @transform_5(%arg0: i32) -> (i32, i32) {
    %c0_i32 = arith.constant 0 : i32
    %c0_i32_0 = arith.constant 0 : i32
    %c0_i32_1 = arith.constant 0 : i32
    return %c0_i32, %c0_i32_0 : i32, i32
  }
  func.func @transform_6(%arg0: i32) -> (i32, i32) {
    %c0_i32 = arith.constant 0 : i32
    %c0_i32_0 = arith.constant 0 : i32
    %c0_i32_1 = arith.constant 0 : i32
    return %c0_i32, %c0_i32_0 : i32, i32
  }
  func.func @transform_7(%arg0: i32) -> (i32, i32) {
    %c0_i32 = arith.constant 0 : i32
    %c0_i32_0 = arith.constant 0 : i32
    %c0_i32_1 = arith.constant 0 : i32
    return %c0_i32, %c0_i32_0 : i32, i32
  }
  func.func @transform_8(%arg0: i32) -> (i32, i32) {
    %c0_i32 = arith.constant 0 : i32
    %c0_i32_0 = arith.constant 0 : i32
    %c0_i32_1 = arith.constant 0 : i32
    return %c0_i32, %c0_i32_0 : i32, i32
  }
  func.func @transform_9(%arg0: i32) -> (i32, i32) {
    %c0_i32 = arith.constant 0 : i32
    %c0_i32_0 = arith.constant 0 : i32
    %c0_i32_1 = arith.constant 0 : i32
    return %c0_i32, %c0_i32_0 : i32, i32
  }
  func.func @transform_10(%arg0: i32) -> (i32, i32) {
    %c0_i32 = arith.constant 0 : i32
    %c0_i32_0 = arith.constant 0 : i32
    %c0_i32_1 = arith.constant 0 : i32
    return %c0_i32, %c0_i32_0 : i32, i32
  }
  func.func @transform_11(%arg0: i32) -> (i32, i32) {
    %c0_i32 = arith.constant 0 : i32
    %c0_i32_0 = arith.constant 0 : i32
    %c0_i32_1 = arith.constant 0 : i32
    return %c0_i32, %c0_i32_0 : i32, i32
  }
  func.func @transform_12(%arg0: i32) -> (i32, i32) {
    %c0_i32 = arith.constant 0 : i32
    %c0_i32_0 = arith.constant 0 : i32
    %c0_i32_1 = arith.constant 0 : i32
    return %c0_i32, %c0_i32_0 : i32, i32
  }
  func.func @transform_13(%arg0: i32) -> (i32, i32) {
    %c0_i32 = arith.constant 0 : i32
    %c0_i32_0 = arith.constant 0 : i32
    %c0_i32_1 = arith.constant 0 : i32
    return %c0_i32, %c0_i32_0 : i32, i32
  }
  func.func @transform_14(%arg0: i32) -> (i32, i32) {
    %c0_i32 = arith.constant 0 : i32
    %c0_i32_0 = arith.constant 0 : i32
    %c0_i32_1 = arith.constant 0 : i32
    return %c0_i32, %c0_i32_0 : i32, i32
  }
  func.func @transform_15(%arg0: i32) -> (i32, i32) {
    %c0_i32 = arith.constant 0 : i32
    %c0_i32_0 = arith.constant 0 : i32
    %c0_i32_1 = arith.constant 0 : i32
    return %c0_i32, %c0_i32_0 : i32, i32
  }
  func.func @transform_16(%arg0: i32) -> (i32, i32) {
    %c0_i32 = arith.constant 0 : i32
    %c0_i32_0 = arith.constant 0 : i32
    %c0_i32_1 = arith.constant 0 : i32
    return %c0_i32, %c0_i32_0 : i32, i32
  }
  func.func @transform_17(%arg0: i32) -> (i32, i32) {
    %c0_i32 = arith.constant 0 : i32
    %c0_i32_0 = arith.constant 0 : i32
    %c0_i32_1 = arith.constant 0 : i32
    return %c0_i32, %c0_i32_0 : i32, i32
  }
  func.func @transform_18(%arg0: i32) -> (i32, i32) {
    %c0_i32 = arith.constant 0 : i32
    %c0_i32_0 = arith.constant 0 : i32
    %c0_i32_1 = arith.constant 0 : i32
    return %c0_i32, %c0_i32_0 : i32, i32
  }
  func.func @transform_19(%arg0: i32) -> (i32, i32) {
    %c0_i32 = arith.constant 0 : i32
    %c0_i32_0 = arith.constant 0 : i32
    %c0_i32_1 = arith.constant 0 : i32
    return %c0_i32, %c0_i32_0 : i32, i32
  }
  func.func @transform_20(%arg0: i32) -> (i32, i32) {
    %c0_i32 = arith.constant 0 : i32
    %c0_i32_0 = arith.constant 0 : i32
    %c0_i32_1 = arith.constant 0 : i32
    return %c0_i32, %c0_i32_0 : i32, i32
  }
  func.func @transform_21(%arg0: i32) -> (i32, i32, i32) {
    %c0_i32 = arith.constant 0 : i32
    %c0_i32_0 = arith.constant 0 : i32
    %c0_i32_1 = arith.constant 0 : i32
    return %arg0, %c0_i32, %c0_i32_0 : i32, i32, i32
  }
}

</mosaic_0001>

<bundles_post_ra>
// kernel: tpu_custom_call.1
= control target key start
LH: loop header
LB: loop body
LE: loop exit
PB: predicated region body
PF: predicated region fallthrough
CT: control target
= control target key end

     0   :  { %s4278_s0 = inlined_call_operand.vmem [shape: f32[2,8,32], index: 0, kind: input, shape index: {}]   ;;  %s4279_s1 = inlined_call_operand.vmem [shape: f32[1,32], index: 1, kind: input, shape index: {}]   ;;  %s4280_s2 = inlined_call_operand.vmem [shape: f32[1,32], index: 2, kind: input, shape index: {}]   ;;  %s4281_s3 = inlined_call_operand.vmem [shape: f32[32,64], index: 3, kind: input, shape index: {}]   ;;  %s4282_s4 = inlined_call_operand.vmem [shape: f32[32,64], index: 4, kind: input, shape index: {}]   ;;  %s4283_s5 = inlined_call_operand.vmem [shape: f32[32,16], index: 5, kind: input, shape index: {}]   ;;  %s4284_s6 = inlined_call_operand.vmem [shape: f32[32,16], index: 6, kind: input, shape index: {}]   ;;  %s4285_s7 = inlined_call_operand.vmem [shape: f32[32,4], index: 7, kind: input, shape index: {}]   ;;  %s4286_s8 = inlined_call_operand.vmem [shape: f32[32,4], index: 8, kind: input, shape index: {}]   ;;  %s4287_s9 = inlined_call_operand.vmem [shape: f32[4,64], index: 9, kind: input, shape index: {}]   ;;  %s4288_s10 = inlined_call_operand.vmem [shape: f32[1,64], index: 10, kind: input, shape index: {}]   ;;  %s4289_s11 = inlined_call_operand.vmem [shape: f32[4,16], index: 11, kind: input, shape index: {}]   ;;  %s4290_s12 = inlined_call_operand.vmem [shape: f32[1,16], index: 12, kind: input, shape index: {}]   ;;  %s4291_s13 = inlined_call_operand.vmem [shape: f32[4,16], index: 13, kind: input, shape index: {}]   ;;  %s4292_s14 = inlined_call_operand.vmem [shape: f32[1,16], index: 14, kind: input, shape index: {}]   ;;  %s4293_s15 = inlined_call_operand.vmem [shape: f32[1,4], index: 15, kind: input, shape index: {}]   ;;  %s4294_s16 = inlined_call_operand.vmem [shape: f32[1,4], index: 16, kind: input, shape index: {}]   ;;  %s4295_s17 = inlined_call_operand.vmem [shape: f32[64,4], index: 17, kind: input, shape index: {}]   ;;  %s4296_s18 = inlined_call_operand.vmem [shape: f32[1,4], index: 18, kind: input, shape index: {}]   ;;  %s4297_s19 = inlined_call_operand.vmem [shape: f32[1,64], index: 19, kind: input, shape index: {}]   ;;  %s4298_s20 = inlined_call_operand.vmem [shape: f32[64,32], index: 20, kind: input, shape index: {}]   ;;  %s4299_s21 = inlined_call_operand.hbm [shape: f32[2,8,32], index: 21, kind: output, shape index: {}]  }
   0x1   :  { %4311 = sst [smem:[#allocation11_spill]] %s4278_s0 }
   0x2   :  { %4312 = sst [smem:[#allocation12_spill]] %s4279_s1 }
   0x3   :  { %4313 = sst [smem:[#allocation13_spill]] %s4280_s2 }
   0x4   :  { %4314 = sst [smem:[#allocation14_spill]] %s4281_s3 }
   0x5   :  { %4315 = sst [smem:[#allocation15_spill]] %s4282_s4 }
   0x6   :  { %4316 = sst [smem:[#allocation16_spill]] %s4283_s5 }
   0x7   :  { %4317 = sst [smem:[#allocation17_spill]] %s4284_s6 }
   0x8   :  { %4318 = sst [smem:[#allocation18_spill]] %s4285_s7 }
   0x9   :  { %4319 = sst [smem:[#allocation19_spill]] %s4286_s8 }
   0xa   :  { %4320 = sst [smem:[#allocation20_spill]] %s4287_s9 }
   0xb   :  { %4321 = sst [smem:[#allocation21_spill]] %s4288_s10 }
   0xc   :  { %4322 = sst [smem:[#allocation22_spill]] %s4299_s21 }
   0xd   :  { %26 = vsyncpa [#allocation3], 0 }
   0xe   :  { %28 = vsyncpa [#allocation3 + $0x1], 0  ;;  %s3762_s2 = smov 0   ;;  %s3764_s25 = smov 0  }
   0xf   :  { %s3766_s26 = smov 0   ;;  %s3768_s27 = smov 0  }
  0x10 LB: > { %4323 = sst [smem:[#allocation5_spill]] %s3635_s2  ;;  %s3783_s3 = sadd.s32 4294967295, %s3647_s27   ;;  %s3647_s27 = sphi %s3768_s27, %s4346_s27   ;;  %s3643_s26 = sphi %s3766_s26, %s4348_s26   ;;  %s3639_s25 = sphi %s3764_s25, %s4350_s25   ;;  %s3635_s2 = sphi %s3762_s2, %s4349_s2  }
  0x11   : > { %4324 = sst [smem:[#allocation6_spill]] %s3643_s26  ;;  %s3134_s28 = sadd.s32 4294967294, %s3647_s27  }
  0x12   : > { %4325 = sst [smem:[#allocation7_spill]] %s3647_s27  ;;  %s3787_s29 = sadd.s32 1, %s3647_s27  }
  0x13   : > { %4326 = sst [smem:[#allocation8_spill]] %s3787_s29  ;;  %s487_s0 = sadd.s32 1, %s3643_s26 }
  0x14   : > { %s484_s4 = ssub.s32 %s3647_s27, %s3787_s29  ;;  %p497_p0 = scmp.ne.s32.totalorder %s3643_s26, %s3639_s25 }
  0x15   : > { %p485_p1 = scmp.eq.s32.totalorder %s484_s4, 0  ;;  %p498_p2 = scmp.eq.s32.totalorder %s3783_s3, 1 }
  0x16   : > { %p503_p3 = scmp.ne.s32.totalorder %s3639_s25, %s3635_s2  ;;  %p504_p4 = scmp.eq.s32.totalorder %s3134_s28, 1 }
  0x17   : > { %s3798_s30 = scalar_select %p485_p1, %s3643_s26, %s487_s0  }
  0x18   : > { %p3800_p5 = por %p498_p2, %p497_p0  ;;  %p3804_p6 = por %p504_p4, %p503_p3 }
  0x19   : > { %4327 = sst [smem:[#allocation9_spill]] %s3798_s30  ;;  %p3137_p7 = scmp.ge.s32.totalorder %s3647_s27, 1 }
  0x1a   : > { %s4329_s22 = scalar_select %p3804_p6, 1, 0 }
  0x1b   : > { %p589_p8 = scmp.lt.s32.totalorder %s3647_s27, 3 }
  0x1c   : > { %4330 = sst [smem:[#allocation10_spill]] %s4329_s22 }
  0x1d   : > { %p590_p9 = pnand %p3137_p7, %p589_p8 }
  0x1e   : > { %s4331_s24 = sld [smem:[#allocation14_spill]] (!%p590_p9)  ;;  %p648_p10 = scmp.lt.s32.totalorder (!%p590_p9), %s3783_s3, 1 }
  0x1f   : > { %593 = sbr.rel (%p590_p9) target bundleno = 2204 (0x89c), region = 104  ;;  %s4332_s30 = sld [smem:[#allocation16_spill]] (!%p590_p9) }
  0x20   : > { %s4333_s21 = sld [smem:[#allocation11_spill]] (!%p590_p9)  ;;  %s3208_s0 = sshll.u32 (!%p590_p9), %s3783_s3, 7 }
  0x21   : > { %s4335_s6 = sld [smem:[#allocation17_spill]] (!%p590_p9)  ;;  %s3651_s29 = smov (!%p590_p9), [#allocation2]  }
  0x22   : > { %s4336_s7 = sld [smem:[#allocation18_spill]] (!%p590_p9) }
  0x23   : > { %s4337_s8 = sld [smem:[#allocation19_spill]] (!%p590_p9) }
  0x24   : > { %v658_v0 = vld [vmem:[%s4331_s24 + $0x18] sm:$0xff]  ;;  %v3649_v1 = vmov 0.0   ;;  %v657_v2 = vld [vmem:[%s4331_s24 + $0x10] sm:$0xff]  ;;  %vm3650_vm0 = vmmov 0   ;;  %s649_s4 = scalar_select %p648_p10, %s3783_s3, 1  ;;  %v656_v5 = vld [vmem:[%s4331_s24 + $0x8] sm:$0xff]  ;;  %v963_v18 = vlaneseq }
  0x25   : > { %3301 = vmatprep.subr.mxu1 %v3649_v1  ;;  %3309 = vmatprep.mubr.msk.f32.mxu1 %vm3650_vm0, %v3649_v1  ;;  %v810_v3 = vld [vmem:[%s4332_s30 + $0x18] sm:$0xff]  ;;  %v809_v4 = vld [vmem:[%s4332_s30 + $0x10] sm:$0xff]  ;;  %v808_v6 = vld [vmem:[%s4332_s30 + $0x8] sm:$0xff]  ;;  %vm659_vm1 = vcmask 261120   ;;  %vm979_vm4 = vcmask 64512   ;;  %s4338_s9 = sld [smem:[#allocation20_spill]] }
  0x26   : > { %3302 = vmatpush3.msra.mxu1 %v658_v0  ;;  %3323 = vmatprep.subr.mxu0 %v3649_v1  ;;  %s3139_s22 = sshll.u32 %s649_s4, 3  ;;  %v655_v7 = vld [vmem:[%s4331_s24] sm:$0xff]  ;;  %s4334_s4 = sld [smem:[#allocation15_spill]]  ;;  %v3903_v19 = vshrl.u32 %v963_v18, 7  ;;  %v3905_v20 = vand.u32 127, %v963_v18  ;;  %vm2070_vm7 = vcmask 130048  }
  0x27   : > { %3303 = vmatprep.subr.mxu1 %v3649_v1  ;;  %3324 = vmatpush3.msra.mxu0 %v810_v3  ;;  %s651_s28 = scalar_lea.vmem %s4333_s21, %s3139_s22  ;;  %v807_v10 = vld [vmem:[%s4332_s30] sm:$0xff]  ;;  %v884_v14 = vld [vmem:[%s4335_s6 + $0x18] sm:$0xff]  ;;  %v883_v15 = vld [vmem:[%s4335_s6 + $0x10] sm:$0xff]  ;;  %s4339_s10 = sld [smem:[#allocation21_spill]]  ;;  %vm2161_vm10 = vcmask 1043456   ;;  %vm2157_vm12 = vcmask 31744  }
  0x28   : > { %3304 = vmatpush3.msra.mxu1 %v657_v2  ;;  %3325 = vmatprep.subr.mxu0 %v3649_v1  ;;  %v3843_v8 = vld [vmem:[%s651_s28] sm:$0xff]  ;;  %v882_v16 = vld [vmem:[%s4335_s6 + $0x8] sm:$0xff]  ;;  %v3911_v22 = vsub.s32 %v3903_v19, %v3905_v20  ;;  %v958_v33 = vld [vmem:[%s4336_s7 + $0x18] sm:$0xff]  ;;  %vm1920_vm6 = vcmp.ge.s32.totalorder %v3903_v19, %v3905_v20  ;;  %vm1923_vm13 = vcmp.le.s32.totalorder %v3903_v19, %v3905_v20  ;;  %vm2707_vm14 = vcmask 523264   ;;  %s645_s21 = sand.u32 1, %s3639_s25   ;;  %s4340_s1 = sld [smem:[#allocation12_spill]] }
  0x29   : > { %3305 = vmatprep.subr.mxu1 %v3649_v1  ;;  %3326 = vmatpush3.msra.mxu0 %v809_v4  ;;  %v881_v17 = vld [vmem:[%s4335_s6] sm:$0xff]  ;;  %v957_v34 = vld [vmem:[%s4336_s7 + $0x10] sm:$0xff]  ;;  %v956_v35 = vld [vmem:[%s4336_s7 + $0x8] sm:$0xff]  ;;  %s3138_s22 = sshll.u32 %s645_s21, 3  ;;  %s4341_s27 = sld [smem:[#allocation13_spill]] }
  0x2a   : > { %3306 = vmatpush3.msra.mxu1 %v656_v5  ;;  %3327 = vmatprep.subr.mxu0 %v3649_v1  ;;  %vm976_vm2 = vcmp.eq.s32.totalorder %v3911_v22, 3  ;;  %vm1060_vm3 = vcmp.eq.s32.totalorder %v3911_v22, 2  ;;  %vm1143_vm5 = vcmp.eq.s32.totalorder %v3911_v22, 1  ;;  %v962_v36 = vld [vmem:[%s4337_s8 + $0x18] sm:$0xff]  ;;  %v955_v37 = vld [vmem:[%s4336_s7] sm:$0xff]  ;;  %v961_v38 = vld [vmem:[%s4337_s8 + $0x10] sm:$0xff] }
  0x2b   : > { %3307 = vmatprep.subr.mxu1 %v3649_v1  ;;  %3328 = vmatpush3.msra.mxu0 %v808_v6  ;;  %v3145_v26 = vsel %vm976_vm2, 1.0, %v3649_v1  ;;  %v3148_v27 = vsel %vm1060_vm3, 1.0, %v3649_v1  ;;  %v3931_v30 = vsel %vm1143_vm5, 1.0, %v3649_v1  ;;  %v960_v39 = vld [vmem:[%s4337_s8 + $0x8] sm:$0xff]  ;;  %v959_v40 = vld [vmem:[%s4337_s8] sm:$0xff]  ;;  %vm2616_vm15 = vcmp.eq.s32.totalorder %v3911_v22, 4294967295 }
  0x2c   : > { %v736_v9 = vld [vmem:[%s4334_s4 + $0x18] sm:$0xff]  ;;  %3308 = vmatpush3.msra.mxu1 %v655_v7  ;;  %3329 = vmatprep.subr.mxu0 %v3649_v1  ;;  %v735_v11 = vld [vmem:[%s4334_s4 + $0x10] sm:$0xff]  ;;  %v734_v12 = vld [vmem:[%s4334_s4 + $0x8] sm:$0xff]  ;;  %s647_s23 = scalar_lea.vmem [#allocation2], %s3138_s22  ;;  %s4342_s8 = sld [smem:[#allocation22_spill]] }
  0x2d   : > { %3310 = vmatmul.mubr.msk.f32.vlgmr.msra.gmra.mxu1 %vm659_vm1, %v3843_v8  ;;  %3312 = vmatprep.subr.mxu1 %v3649_v1  ;;  %v733_v13 = vld [vmem:[%s4334_s4] sm:$0xff]  ;;  %s3075_s4 = sshll.u32 %s647_s23, 4  ;;  %s3076_s4 = int_to_ptr.vmem [resolvable:$true] %s3075_s4 }
  0x2e   : > { %3313 = vmatpush3.msra.mxu1 %v736_v9  ;;  %3320 = vmatprep.mubr.msk.f32.mxu1 %vm3650_vm0, %v3649_v1  ;;  %v3147_v41 = vld [vmem:[%s4338_s9] ss:$0 sm:$0xff]  ;;  %v3150_v45 = vld [vmem:[%s4338_s9 + $0x1] ss:$0 sm:$0xff]  ;;  %v3153_v51 = vld [vmem:[%s4338_s9 + $0x2] ss:$0 sm:$0xff] }
  0x2f   : > { %3314 = vmatprep.subr.mxu1 %v3649_v1  ;;  %3330 = vmatpush3.msra.mxu0 %v807_v10  ;;  %v3144_v42 = vld [vmem:[%s4339_s10] ss:$0 sm:$0xff]  ;;  %v3154_v52 = vld [vmem:[%s4338_s9 + $0x3] ss:$0 sm:$0xff]  ;;  %v3160_v60 = vld [vmem:[%s4289_s11 + $0x1] ss:$0 sm:$0xff] }
  0x30   : > { %3315 = vmatpush3.msra.mxu1 %v735_v11  ;;  %3331 = vmatprep.mubr.msk.f32.mxu0 %vm3650_vm0, %v3649_v1  ;;  %v3158_v56 = vld [vmem:[%s4289_s11] ss:$0 sm:$0xff]  ;;  %v3162_v11 = vld [vmem:[%s4289_s11 + $0x2] ss:$0 sm:$0xff]  ;;  %s3062_s10 = scalar_lea.sflag [#allocation3], %s645_s21  ;;  %s3587_s26 = scalar_lea.vmem %s3076_s4, 128 }
  0x31   : > { %3316 = vmatprep.subr.mxu1 %v3649_v1  ;;  %3332 = vmatmul.mubr.msk.f32.vlgmr.msra.gmra.mxu0 %vm659_vm1, %v3843_v8  ;;  %v3156_v0 = vld [vmem:[%s4290_s12] ss:$0 sm:$0xff]  ;;  %p3588_p11 = scmp.ne.s32.totalorder %s3076_s4, %s3587_s26 }
  0x32   : > { %3317 = vmatpush3.msra.mxu1 %v734_v12  ;;  %3345 = vmatprep.subr.mxu0 %v3649_v1  ;;  %v3167_v9 = vld [vmem:[%s4291_s13] ss:$0 sm:$0xff]  ;;  %s3073_s9 = scalar_lea.hbm %s4342_s8, %s3208_s0 }
  0x33   : > { %3318 = vmatprep.subr.mxu1 %v3649_v1  ;;  %3347 = vmatprep.mubr.msk.f32.mxu0 %vm3650_vm0, %v3649_v1  ;;  %v3165_v12 = vld [vmem:[%s4292_s14] ss:$0 sm:$0xff]  ;;  %p3589_p12 = pnand %p3588_p11, %p3800_p5 }
  0x34   : > { %3319 = vmatpush3.msra.mxu1 %v733_v13  ;;  %v3197_v22 = vld [vmem:[%s4296_s18] ss:$0 sm:$0xff] }
  0x35   : > { %3321 = vmatmul.mubr.msk.f32.vlgmr.msra.gmra.mxu1 %vm659_vm1, %v3843_v8  ;;  %3334 = vmatprep.subr.mxu1 %v3649_v1  ;;  %p3590_p13 = pneg %p3589_p12 }
  0x36   : > { %3335 = vmatpush3.msra.mxu1 %v884_v14  ;;  %3342 = vmatprep.mubr.msk.f32.mxu1 %vm3650_vm0, %v3649_v1 }
  0x37   : > { %3336 = vmatprep.subr.mxu1 %v3649_v1 }
  0x38   : > { %3337 = vmatpush3.msra.mxu1 %v883_v15  ;;  %v3169_v15 = vld [vmem:[%s4291_s13 + $0x1] ss:$0 sm:$0xff] }
  0x39   : > { %3338 = vmatprep.subr.mxu1 %v3649_v1 }
  0x3a   : > { %3339 = vmatpush3.msra.mxu1 %v882_v16 }
  0x3b   : > { %3340 = vmatprep.subr.mxu1 %v3649_v1 }
  0x3c   : > { %3341 = vmatpush3.msra.mxu1 %v881_v17 }
  0x3d   : > { %3343 = vmatmul.mubr.msk.f32.vlgmr.msra.gmra.mxu1 %vm659_vm1, %v3843_v8  ;;  %3350 = vmatprep.subr.mxu1 %v3649_v1 }
  0x3e   : > { %3352 = vmatprep.mubr.msk.f32.mxu1 %vm3650_vm0, %v3649_v1 }
  0xed   : > { %v3907_v21 = vpop.f32.mrf.mxu1 }
  0xef   : > { %v3311_v23 = vpop.f32.mrf.mxu1 }
  0xf1   : > { %v3913_v24 = vpop.f32.mrf.mxu0 }
  0xf3   : > { %v3333_v25 = vpop.f32.mrf.mxu0 }
  0xf4   : > { %v3171_v25 = vld [vmem:[%s4291_s13 + $0x2] ss:$0 sm:$0xff] }
  0xf5   : > { %v3919_v28 = vpop.f32.mrf.mxu1 }
  0xf6   : > { %3346 = vmatpush3.msra.mxu0 %v3919_v28  ;;  %3351 = vmatpush3.msra.mxu1 %v3919_v28  ;;  %v1231_v61 = vmul.f32 %v3154_v52, %v3919_v28 }
  0xf7   : > { %v3322_v29 = vpop.f32.mrf.mxu1  ;;  %3348 = vmatmul.mubr.msk.f32.vlgmr.msra.gmra.mxu0 %vm979_vm4, %v3145_v26  ;;  %3353 = vmatmul.mubr.msk.f32.vlgmr.msra.gmra.mxu1 %vm979_vm4, %v3148_v27 }
  0xf8   : > { %3355 = vmatprep.subr.mxu0 %v3649_v1  ;;  %3360 = vmatprep.subr.mxu1 %v3649_v1  ;;  %v3163_v29 = vld [vmem:[%s4289_s11 + $0x3] ss:$0 sm:$0xff] }
  0xf9   : > { %3356 = vmatpush3.msra.mxu0 %v3919_v28  ;;  %3361 = vmatpush3.msra.mxu1 %v3913_v24 }
  0xfa   : > { %3357 = vmatprep.mubr.msk.f32.mxu0 %vm3650_vm0, %v3649_v1  ;;  %3362 = vmatprep.mubr.msk.f32.mxu1 %vm3650_vm0, %v3649_v1 }
  0xfb   : > { %3365 = vmatprep.subr.mxu0 %v3649_v1  ;;  %3370 = vmatprep.subr.mxu1 %v3649_v1 }
  0xfc   : > { %3358 = vmatmul.mubr.msk.f32.vlgmr.msra.gmra.mxu0 %vm979_vm4, %v3931_v30  ;;  %3363 = vmatmul.mubr.msk.f32.vlgmr.msra.gmra.mxu1 %vm979_vm4, %v3145_v26 }
  0xfd   : > { %3366 = vmatpush3.msra.mxu0 %v3913_v24  ;;  %3371 = vmatpush3.msra.mxu1 %v3913_v24  ;;  %v3944_v31 = vpop.f32.mrf.mxu1 }
  0xfe   : > { %3367 = vmatprep.mubr.msk.f32.mxu0 %vm3650_vm0, %v3649_v1  ;;  %3372 = vmatprep.mubr.msk.f32.mxu1 %vm3650_vm0, %v3649_v1 }
  0xff   : > { %v3344_v32 = vpop.f32.mrf.mxu1  ;;  %3375 = vmatprep.subr.mxu0 %v3649_v1  ;;  %3380 = vmatprep.subr.mxu1 %v3649_v1 }
 0x100   : > { %3368 = vmatmul.mubr.msk.f32.vlgmr.msra.gmra.mxu0 %vm979_vm4, %v3148_v27  ;;  %3373 = vmatmul.mubr.msk.f32.vlgmr.msra.gmra.mxu1 %vm979_vm4, %v3931_v30 }
 0x101   : > { %3376 = vmatpush3.msra.mxu0 %v3944_v31  ;;  %3381 = vmatpush3.msra.mxu1 %v3944_v31 }
 0x102   : > { %3377 = vmatprep.mubr.msk.f32.mxu0 %vm3650_vm0, %v3649_v1  ;;  %3382 = vmatprep.mubr.msk.f32.mxu1 %vm3650_vm0, %v3649_v1 }
 0x103   : > { %3385 = vmatprep.subr.mxu0 %v3649_v1  ;;  %3390 = vmatprep.subr.mxu1 %v3649_v1 }
 0x104   : > { %3378 = vmatmul.mubr.msk.f32.vlgmr.msra.gmra.mxu0 %vm979_vm4, %v3145_v26  ;;  %3383 = vmatmul.mubr.msk.f32.vlgmr.msra.gmra.mxu1 %vm979_vm4, %v3148_v27 }
 0x105   : > { %3386 = vmatpush3.msra.mxu0 %v3944_v31  ;;  %3391 = vmatpush3.msra.mxu1 %v958_v33 }
 0x106   : > { %3392 = vmatprep.subr.mxu1 %v3649_v1  ;;  %3387 = vmatprep.mubr.msk.f32.mxu0 %vm3650_vm0, %v3649_v1 }
 0x107   : > { %3393 = vmatpush3.msra.mxu1 %v957_v34  ;;  %3401 = vmatprep.subr.mxu0 %v3649_v1 }
 0x108   : > { %3394 = vmatprep.subr.mxu1 %v3649_v1  ;;  %3388 = vmatmul.mubr.msk.f32.vlgmr.msra.gmra.mxu0 %vm979_vm4, %v3931_v30 }
 0x109   : > { %3395 = vmatpush3.msra.mxu1 %v956_v35  ;;  %3402 = vmatpush3.msra.mxu0 %v962_v36  ;;  %v3174_v36 = vld [vmem:[%s4293_s15] ss:$0 sm:$0xff] }
 0x10a   : > { %3396 = vmatprep.subr.mxu1 %v3649_v1  ;;  %3403 = vmatprep.subr.mxu0 %v3649_v1 }
 0x10b   : > { %3397 = vmatpush3.msra.mxu1 %v955_v37  ;;  %3398 = vmatprep.mubr.msk.f32.mxu1 %vm3650_vm0, %v3649_v1 }
 0x10c   : > { %3404 = vmatpush3.msra.mxu0 %v961_v38  ;;  %3399 = vmatmul.mubr.msk.f32.vlgmr.msra.gmra.mxu1 %vm659_vm1, %v3843_v8  ;;  %v1484_v38 = vmul.f32 %v3163_v29, %v3913_v24 }
 0x10d   : > { %3405 = vmatprep.subr.mxu0 %v3649_v1  ;;  %3409 = vmatprep.mubr.msk.f32.mxu0 %vm3650_vm0, %v3649_v1 }
 0x10e   : > { %3406 = vmatpush3.msra.mxu0 %v960_v39  ;;  %3412 = vmatprep.subr.mxu1 %v3649_v1  ;;  %v3172_v39 = vld [vmem:[%s4291_s13 + $0x3] ss:$0 sm:$0xff] }
 0x10f   : > { %3407 = vmatprep.subr.mxu0 %v3649_v1  ;;  %3414 = vmatprep.mubr.msk.f32.mxu1 %vm3650_vm0, %v3649_v1 }
 0x110   : > { %3408 = vmatpush3.msra.mxu0 %v959_v40 }
 0x111   : > { %3410 = vmatmul.mubr.msk.f32.vlgmr.msra.gmra.mxu0 %vm659_vm1, %v3843_v8  ;;  %3417 = vmatprep.subr.mxu0 %v3649_v1 }
 0x112   : > { %3419 = vmatprep.mubr.msk.f32.mxu0 %vm3650_vm0, %v3649_v1 }
 0x1b7   : > { %v1049_v43 = vpop.f32.mrf.mxu0  ;;  %v1132_v44 = vpop.f32.mrf.mxu1 }
 0x1b8   : > { %v1058_v46 = vmul.f32 %v3147_v41, %v1049_v43  ;;  %v1141_v50 = vmul.f32 %v3150_v45, %v1132_v44  ;;  %v1737_v45 = vmul.f32 %v3172_v39, %v3944_v31 }
 0x1b9   : > { %v3349_v47 = vpop.f32.mrf.mxu0  ;;  %v3354_v48 = vpop.f32.mrf.mxu1 }
 0x1ba   : > { %v1059_v49 = vadd.f32 %v3144_v42, %v1058_v46 }
 0x1bc   : > { %v1142_v53 = vadd.f32 %v1141_v50, %v1059_v49  ;;  %v1215_v54 = vpop.f32.mrf.mxu0  ;;  %v1314_v55 = vpop.f32.mrf.mxu1 }
 0x1bd   : > { %v1224_v57 = vmul.f32 %v3153_v51, %v1215_v54  ;;  %v1323_v63 = vmul.f32 %v3158_v56, %v1314_v55 }
 0x1be   : > { %v3359_v58 = vpop.f32.mrf.mxu0  ;;  %v3364_v59 = vpop.f32.mrf.mxu1 }
 0x1bf   : > { %v1225_v62 = vadd.f32 %v1224_v57, %v1142_v53  ;;  %v1324_v10 = vadd.f32 %v3156_v0, %v1323_v63 }
 0x1c0   : > { %v1391_v2 = vpop.f32.mrf.mxu0  ;;  %v1468_v3 = vpop.f32.mrf.mxu1 }
 0x1c1   : > { %v4040_v4 = vadd.f32 %v1231_v61, %v1225_v62  ;;  %v1400_v5 = vmul.f32 %v3160_v60, %v1391_v2  ;;  %v1477_v26 = vmul.f32 %v3162_v11, %v1468_v3 }
 0x1c2   : > { %v3369_v6 = vpop.f32.mrf.mxu0  ;;  %v3374_v7 = vpop.f32.mrf.mxu1 }
 0x1c3   : > { %v1401_v16 = vadd.f32 %v1400_v5, %v1324_v10  ;;  %v3177_v5 = vld [vmem:[%s4294_s16] ss:$0 sm:$0xff] }
 0x1c4   : > { %v1567_v13 = vpop.f32.mrf.mxu0  ;;  %v1644_v14 = vpop.f32.mrf.mxu1 }
 0x1c5   : > { %v1576_v17 = vmul.f32 %v3167_v9, %v1567_v13  ;;  %v1653_v28 = vmul.f32 %v3169_v15, %v1644_v14  ;;  %v1478_v33 = vadd.f32 %v1477_v26, %v1401_v16  ;;  %v4074_v13 = vsel %vm1920_vm6, 1.0, %v3649_v1 }
 0x1c6   : > { %v3379_v18 = vpop.f32.mrf.mxu0  ;;  %v3384_v23 = vpop.f32.mrf.mxu1 }
 0x1c7   : > { %v1577_v27 = vadd.f32 %v3165_v12, %v1576_v17  ;;  %v1485_v41 = vadd.f32 %v1484_v38, %v1478_v33  ;;  %v2149_v23 = vadd.s32 1, %v3903_v19 }
 0x1c8   : > { %v1721_v32 = vpop.f32.mrf.mxu0 }
 0x1c9   : > { %v1654_v34 = vadd.f32 %v1653_v28, %v1577_v27  ;;  %v1730_v35 = vmul.f32 %v3171_v25, %v1721_v32  ;;  %v3164_v47 = vmul.f32 -1.442695, %v1485_v41  ;;  %v2147_v25 = vmul.u32 16, %v3903_v19  ;;  %v2698_v19 = vld [vmem:[%s4295_s17 + $0x30] sm:$0xff] }
 0x1ca   : > { %v3389_v37 = vpop.f32.mrf.mxu0  ;;  %v2150_v26 = vmul.u32 16, %v2149_v23 }
 0x1cb   : > { %v1731_v42 = vadd.f32 %v1730_v35, %v1654_v34  ;;  %3551 = vpow2.f32 %v3164_v47  ;;  %vm2148_vm8 = vcmp.ge.s32.totalorder %v3905_v20, %v2147_v25 }
 0x1cc   : > { %v1820_v40 = vpop.f32.mrf.mxu1  ;;  %vm2151_vm9 = vcmp.lt.s32.totalorder %v3905_v20, %v2150_v26  ;;  %v2697_v20 = vld [vmem:[%s4295_s17 + $0x28] sm:$0xff] }
 0x1cd   : > { %v1821_v43 = vadd.f32 %v3174_v36, %v1820_v40  ;;  %v1738_v48 = vadd.f32 %v1737_v45, %v1731_v42  ;;  %vm2152_vm11 = vmand %vm2148_vm8, %vm2151_vm9 }
 0x1ce   : > { %v3400_v44 = vpop.f32.mrf.mxu1  ;;  %v4097_v27 = vsel %vm2152_vm11, 1.0, %v3649_v1 }
 0x1cf   : > { %v1825_v46 = vand.u32 2147483647, %v1821_v43  ;;  %v3173_v54 = vmul.f32 -1.442695, %v1738_v48  ;;  %v1824_v2 = vmax.f32 %v1821_v43, 0.0 }
 0x1d1   : > { %v1826_v49 = vsub.f32 0.0, %v1825_v46  ;;  %v1899_v50 = vpop.f32.mrf.mxu0  ;;  %v3155_v46 = vmul.f32 -1.442695, %v4040_v4 }
 0x1d2   : > { %v1900_v51 = vadd.f32 %v3174_v36, %v1899_v50 }
 0x1d3   : > { %v1827_v52 = vmul.f32 1.442695, %v1826_v49  ;;  %v3411_v53 = vpop.f32.mrf.mxu0 }
 0x1d4   : > { %v1904_v24 = vand.u32 2147483647, %v1900_v51  ;;  %v1903_v9 = vmax.f32 %v1900_v51, 0.0 }
 0x1d5   : > { %3553 = vpow2.f32 %v1827_v52 }
 0x1d6   : > { %v1905_v55 = vsub.f32 0.0, %v1904_v24  ;;  %3555 = vpow2.f32 %v3173_v54 }
 0x1d8   : > { %v1906_v56 = vmul.f32 1.442695, %v1905_v55  ;;  %v3552_v57 = vpop.eup %3551 }
 0x1d9   : > { %v1489_v31 = vadd.f32 1.0, %v3552_v57 }
 0x1da   : > { %3557 = vpow2.f32 %v1906_v56 }
 0x1e2   : > { %v3554_v58 = vpop.eup %3553 }
 0x1e3   : > { %v1829_v59 = vadd.f32 1.0, %v3554_v58  ;;  %v3556_v60 = vpop.eup %3555 }
 0x1e4   : > { %v1742_v63 = vadd.f32 1.0, %v3556_v60 }
 0x1e5   : > { %3559 = vlog2.f32 %v1829_v59 }
 0x1e6   : > { %3561 = vrcp.f32 %v1489_v31 }
 0x1e7   : > { %v3558_v61 = vpop.eup %3557 }
 0x1e8   : > { %v1908_v62 = vadd.f32 1.0, %v3558_v61  ;;  %v3179_v61 = vsel %vm1923_vm13, 1.0, %v3649_v1 }
 0x1ea   : > { %3563 = vlog2.f32 %v1908_v62 }
 0x1eb   : > { %3565 = vrcp.f32 %v1742_v63 }
 0x1f2   : > { %v3560_v0 = vpop.eup %3559 }
 0x1f3   : > { %v1831_v3 = vmul.f32 0.6931472, %v3560_v0  ;;  %v3562_v6 = vpop.eup %3561 }
 0x1f4   : > { %v1492_v15 = vmul.f32 %v3562_v6, %v1485_v41  ;;  %v2695_v6 = vld [vmem:[%s4295_s17 + $0x18] sm:$0xff] }
 0x1f5   : > { %v1832_v7 = vadd.f32 %v1831_v3, %v1824_v2  ;;  %v2699_v3 = vld [vmem:[%s4295_s17 + $0x38] sm:$0xff] }
 0x1f7   : > { %v3564_v10 = vpop.eup %3563  ;;  %v1918_v11 = vmul.f32 %v3177_v5, %v1832_v7 }
 0x1f8   : > { %v1910_v12 = vmul.f32 0.6931472, %v3564_v10  ;;  %v3566_v14 = vpop.eup %3565  ;;  %v2692_v10 = vld [vmem:[%s4295_s17] sm:$0xff] }
 0x1f9   : > { %3413 = vmatpush3.msra.mxu1 %v1918_v11  ;;  %v1745_v18 = vmul.f32 %v3566_v14, %v1738_v48 }
 0x1fa   : > { %v4076_v16 = vadd.f32 %v1910_v12, %v1903_v9  ;;  %3415 = vmatmul.mubr.msk.f32.vlgmr.msra.gmra.mxu1 %vm979_vm4, %v4074_v13  ;;  %3422 = vmatprep.subr.mxu1 %v3649_v1  ;;  %v2693_v9 = vld [vmem:[%s4295_s17 + $0x8] sm:$0xff] }
 0x1fb   : > { %3423 = vmatpush3.xpose.msk.msra.mxu1 %vm2070_vm7, %v1492_v15  ;;  %3424 = vmatprep.mubr.msk.f32.mxu1 %vm3650_vm0, %v3649_v1 }
 0x1fc   : > { %v1919_v17 = vmul.f32 %v3177_v5, %v4076_v16  ;;  %3432 = vmatprep.subr.mxu1 %v3649_v1  ;;  %v2696_v5 = vld [vmem:[%s4295_s17 + $0x20] sm:$0xff] }
 0x1fe   : > { %3418 = vmatpush3.msra.mxu0 %v1919_v17  ;;  %3425 = vmatmul.mubr.msk.f32.vlgmr.msra.gmra.mxu1 %vm2070_vm7, %v1745_v18 }
 0x1ff   : > { %3420 = vmatmul.mubr.msk.f32.vlgmr.msra.gmra.mxu0 %vm979_vm4, %v4074_v13  ;;  %3427 = vmatprep.subr.mxu0 %v3649_v1 }
 0x200   : > { %3429 = vmatprep.mubr.msk.f32.mxu0 %vm3650_vm0, %v3649_v1  ;;  %3434 = vmatprep.mubr.msk.f32.mxu1 %vm3650_vm0, %v3649_v1 }
 0x201   : > { %3428 = vmatpush3.msk.msra.mxu0 %vm2161_vm10, %v4097_v27  ;;  %3433 = vmatpush3.msk.msra.mxu1 %vm2161_vm10, %v4097_v27 }
 0x202   : > { %3442 = vmatprep.subr.mxu1 %v3649_v1  ;;  %3437 = vmatprep.subr.mxu0 %v3649_v1 }
 0x2ba   : > { %v1995_v28 = vpop.f32.mrf.mxu1 }
 0x2bb   : > { %v2155_v29 = vmul.f32 1.442695, %v1995_v28  ;;  %v2236_v32 = vsub.f32 0.0, %v1995_v28 }
 0x2bc   : > { %v3416_v33 = vpop.f32.mrf.mxu1 }
 0x2bd   : > { %3567 = vpow2.f32 %v2155_v29  ;;  %v2237_v34 = vmul.f32 1.442695, %v2236_v32 }
 0x2be   : > { %v2143_v36 = vpop.f32.mrf.mxu1 }
 0x2bf   : > { %v2065_v35 = vpop.f32.mrf.mxu0  ;;  %3569 = vpow2.f32 %v2237_v34  ;;  %v2235_v55 = vmul.f32 %v4074_v13, %v2143_v36  ;;  %v2464_v0 = vmul.f32 %v3179_v61, %v2143_v36  ;;  %v3195_v13 = vsel %vm2616_vm15, 1.0, %v3649_v1 }
 0x2c0   : > { %v2069_v37 = vsub.f32 %v2065_v35, %v1919_v17  ;;  %v3426_v38 = vpop.f32.mrf.mxu1 }
 0x2c1   : > { %v3421_v39 = vpop.f32.mrf.mxu0 }
 0x2c2   : > { %v2388_v40 = vsub.f32 0.0, %v2069_v37  ;;  %v2465_v49 = vmul.f32 1.442695, %v2069_v37 }
 0x2c4   : > { %v2389_v41 = vmul.f32 1.442695, %v2388_v40 }
 0x2c6   : > { %3571 = vpow2.f32 %v2389_v41 }
 0x2c7   : > { %3573 = vpow2.f32 %v3155_v46  ;;  %v2953_v46 = vld [vmem:[%s4298_s20 + $0x10] sm:$0xff] }
 0x2ca   : > { %v3568_v42 = vpop.eup %3567 }
 0x2cb   : > { %3430 = vmatmul.mubr.msk.f32.vlgmr.msra.gmra.mxu0 %vm2157_vm12, %v3568_v42  ;;  %v2958_v42 = vld [vmem:[%s4298_s20 + $0x38] sm:$0xff] }
 0x2cc   : > { %v3570_v43 = vpop.eup %3569  ;;  %3439 = vmatprep.mubr.msk.f32.mxu0 %vm3650_vm0, %v3649_v1 }
 0x2cd   : > { %v2239_v44 = vmul.f32 %v3570_v43, %v1832_v7  ;;  %v2694_v7 = vld [vmem:[%s4295_s17 + $0x10] sm:$0xff] }
 0x2ce   : > { %v2957_v43 = vld [vmem:[%s4298_s20 + $0x30] sm:$0xff] }
 0x2cf   : > { %3435 = vmatmul.mubr.msk.f32.vlgmr.msra.gmra.mxu1 %vm2157_vm12, %v2239_v44  ;;  %v2955_v44 = vld [vmem:[%s4298_s20 + $0x20] sm:$0xff] }
 0x2d0   : > { %3443 = vmatpush3.msk.msra.mxu1 %vm2161_vm10, %v4097_v27  ;;  %3444 = vmatprep.mubr.msk.f32.mxu1 %vm3650_vm0, %v3649_v1 }
 0x2d1   : > { %3452 = vmatprep.subr.mxu1 %v3649_v1 }
 0x2d3   : > { %v3572_v45 = vpop.eup %3571 }
 0x2d4   : > { %3445 = vmatmul.mubr.msk.f32.vlgmr.msra.gmra.mxu1 %vm2157_vm12, %v3572_v45  ;;  %v3574_v47 = vpop.eup %3573  ;;  %v2954_v45 = vld [vmem:[%s4298_s20 + $0x18] sm:$0xff] }
 0x2d5   : > { %3454 = vmatprep.mubr.msk.f32.mxu1 %vm3650_vm0, %v3649_v1  ;;  %v1236_v48 = vadd.f32 1.0, %v3574_v47  ;;  %v2952_v47 = vld [vmem:[%s4298_s20 + $0x8] sm:$0xff] }
 0x2d7   : > { %3575 = vrcp.f32 %v1236_v48  ;;  %v2951_v48 = vld [vmem:[%s4298_s20] sm:$0xff] }
 0x2d8   : > { %3577 = vpow2.f32 %v2465_v49 }
 0x2e4   : > { %v3576_v50 = vpop.eup %3575 }
 0x2e5   : > { %v4119_v53 = vmul.f32 %v3576_v50, %v4040_v4  ;;  %v3578_v57 = vpop.eup %3577 }
 0x2e6   : > { %v2467_v59 = vmul.f32 %v3578_v57, %v4076_v16 }
 0x38b   : > { %v2231_v51 = vpop.f32.mrf.mxu0 }
 0x38d   : > { %v3431_v52 = vpop.f32.mrf.mxu0 }
 0x38f   : > { %v2309_v24 = vpop.f32.mrf.mxu1 }
 0x390   : > { %v2313_v54 = vmul.f32 %v2309_v24, %v4119_v53 }
 0x391   : > { %v3436_v56 = vpop.f32.mrf.mxu1 }
 0x392   : > { %3438 = vmatpush3.msra.mxu0 %v2313_v54 }
 0x393   : > { %3440 = vmatmul.mubr.msk.f32.vlgmr.msra.gmra.mxu0 %vm979_vm4, %v2235_v55  ;;  %3447 = vmatprep.subr.mxu0 %v3649_v1 }
 0x394   : > { %v2460_v58 = vpop.f32.mrf.mxu1  ;;  %3448 = vmatpush3.msk.msra.mxu0 %vm2161_vm10, %v4097_v27  ;;  %3449 = vmatprep.mubr.msk.f32.mxu0 %vm3650_vm0, %v3649_v1 }
 0x395   : > { %3457 = vmatprep.subr.mxu0 %v3649_v1 }
 0x396   : > { %v3446_v4 = vpop.f32.mrf.mxu1 }
 0x397   : > { %3450 = vmatmul.mubr.msk.f32.vlgmr.msra.gmra.mxu0 %vm2157_vm12, %v2467_v59 }
 0x398   : > { %3459 = vmatprep.mubr.msk.f32.mxu0 %vm3650_vm0, %v3649_v1 }
 0x453   : > { %v2383_v31 = vpop.f32.mrf.mxu0 }
 0x454   : > { %v2387_v15 = vmul.f32 %v2383_v31, %v2231_v51 }
 0x455   : > { %v3441_v60 = vpop.f32.mrf.mxu0 }
 0x457   : > { %v2537_v62 = vpop.f32.mrf.mxu0 }
 0x458   : > { %v2541_v63 = vmul.f32 %v2537_v62, %v4119_v53 }
 0x459   : > { %v3451_v2 = vpop.f32.mrf.mxu0 }
 0x45a   : > { %3453 = vmatpush3.msra.mxu1 %v2541_v63 }
 0x45b   : > { %3455 = vmatmul.mubr.msk.f32.vlgmr.msra.gmra.mxu1 %vm979_vm4, %v2464_v0  ;;  %3462 = vmatprep.subr.mxu1 %v3649_v1  ;;  %v3205_v0 = vld [vmem:[%s4340_s1] ss:$0 sm:$0xff]  ;;  %s3591_s1 = sshll.u32 %s3651_s29, 4  ;;  %s3592_s1 = int_to_ptr.vmem [resolvable:$false] %s3591_s1 }
 0x45c   : > { %3463 = vmatpush3.msra.mxu1 %v2699_v3  ;;  %3478 = vmatprep.mubr.msk.f32.mxu1 %vm3650_vm0, %v3649_v1  ;;  %v3206_v3 = vld [vmem:[%s4341_s27] ss:$0 sm:$0xff]  ;;  %s3593_s3 = scalar_lea.vmem %s3592_s1, 256  ;;  %p3594_p0 = scmp.lt.s32.totalorder %s3076_s4, %s3592_s1 }
 0x45d   : > { %3464 = vmatprep.subr.mxu1 %v3649_v1  ;;  %p3595_p1 = scmp.lt.s32.totalorder %s3593_s3, %s3587_s26 }
 0x45e   : > { %3465 = vmatpush3.msra.mxu1 %v2698_v19 }
 0x45f   : > { %3466 = vmatprep.subr.mxu1 %v3649_v1  ;;  %p3596_p2 = por %p3595_p1, %p3594_p0 }
 0x460   : > { %3467 = vmatpush3.msra.mxu1 %v2697_v20 }
 0x461   : > { %3468 = vmatprep.subr.mxu1 %v3649_v1  ;;  %p3597_p3 = pnand %p3596_p2, %p3590_p13 }
 0x462   : > { %3469 = vmatpush3.msra.mxu1 %v2696_v5 }
 0x463   : > { %3470 = vmatprep.subr.mxu1 %v3649_v1 }
 0x464   : > { %3471 = vmatpush3.msra.mxu1 %v2695_v6 }
 0x465   : > { %3472 = vmatprep.subr.mxu1 %v3649_v1 }
 0x466   : > { %3473 = vmatpush3.msra.mxu1 %v2694_v7 }
 0x467   : > { %3474 = vmatprep.subr.mxu1 %v3649_v1 }
 0x468   : > { %3475 = vmatpush3.msra.mxu1 %v2693_v9 }
 0x469   : > { %3476 = vmatprep.subr.mxu1 %v3649_v1 }
 0x46a   : > { %3477 = vmatpush3.msra.mxu1 %v2692_v10 }
 0x46b   : > { %3479 = vmatmul.mubr.msk.f32.vlgmr.msra.gmra.mxu1 %vm2707_vm14, %v4119_v53 }
 0x51b   : > { %v2611_v11 = vpop.f32.mrf.mxu1 }
 0x51c   : > { %v2615_v12 = vmul.f32 %v2611_v11, %v2460_v58 }
 0x51d   : > { %v3456_v14 = vpop.f32.mrf.mxu1 }
 0x51e   : > { %3458 = vmatpush3.msra.mxu0 %v2615_v12 }
 0x51f   : > { %3481 = vmatprep.subr.mxu0 %v3649_v1  ;;  %3460 = vmatmul.mubr.msk.f32.vlgmr.msra.gmra.mxu0 %vm979_vm4, %v3195_v13 }
 0x520   : > { %3482 = vmatpush3.msra.mxu0 %v2387_v15  ;;  %3483 = vmatprep.mubr.msk.f32.mxu0 %vm3650_vm0, %v3649_v1 }
 0x521   : > { %3486 = vmatprep.subr.mxu0 %v3649_v1 }
 0x523   : > { %3484 = vmatmul.mubr.msk.f32.vlgmr.msra.gmra.mxu0 %vm979_vm4, %v3931_v30  ;;  %v3202_v30 = vmul.f32 -1.442695, %v3907_v21 }
 0x524   : > { %3487 = vmatpush3.msk.msra.mxu0 %vm2161_vm10, %v4097_v27  ;;  %3488 = vmatprep.mubr.msk.f32.mxu0 %vm3650_vm0, %v3649_v1 }
 0x525   : > { %3491 = vmatprep.subr.mxu0 %v3649_v1  ;;  %3579 = vpow2.f32 %v3202_v30 }
 0x52b   : > { %v2777_v16 = vpop.f32.mrf.mxu1 }
 0x52c   : > { %v2778_v17 = vadd.f32 %v3197_v22, %v2777_v16 }
 0x52d   : > { %v3480_v18 = vpop.f32.mrf.mxu1 }
 0x52e   : > { %3489 = vmatmul.mubr.msk.f32.vlgmr.msra.gmra.mxu0 %vm2157_vm12, %v2778_v17 }
 0x52f   : > { %3507 = vmatprep.mubr.msk.f32.mxu0 %vm3650_vm0, %v3649_v1  ;;  %3492 = vmatpush3.msra.mxu0 %v2958_v42 }
 0x530   : > { %3493 = vmatprep.subr.mxu0 %v3649_v1 }
 0x531   : > { %3494 = vmatpush3.msra.mxu0 %v2957_v43 }
 0x532   : > { %v3580_v23 = vpop.eup %3579  ;;  %3495 = vmatprep.subr.mxu0 %v3649_v1 }
 0x533   : > { %v2929_v25 = vadd.f32 1.0, %v3580_v23 }
 0x535   : > { %3581 = vrcp.f32 %v2929_v25 }
 0x542   : > { %v3582_v32 = vpop.eup %3581 }
 0x543   : > { %v2932_v37 = vmul.f32 %v3582_v32, %v3907_v21  ;;  %v2956_v21 = vld [vmem:[%s4298_s20 + $0x28] sm:$0xff] }
 0x544   : > { %3496 = vmatpush3.msra.mxu0 %v2956_v21 }
 0x545   : > { %3497 = vmatprep.subr.mxu0 %v3649_v1 }
 0x546   : > { %3498 = vmatpush3.msra.mxu0 %v2955_v44 }
 0x547   : > { %3499 = vmatprep.subr.mxu0 %v3649_v1 }
 0x548   : > { %3500 = vmatpush3.msra.mxu0 %v2954_v45 }
 0x549   : > { %3501 = vmatprep.subr.mxu0 %v3649_v1 }
 0x54a   : > { %3502 = vmatpush3.msra.mxu0 %v2953_v46 }
 0x54b   : > { %3503 = vmatprep.subr.mxu0 %v3649_v1 }
 0x54c   : > { %3504 = vmatpush3.msra.mxu0 %v2952_v47 }
 0x54d   : > { %3505 = vmatprep.subr.mxu0 %v3649_v1 }
 0x54e   : > { %3506 = vmatpush3.msra.mxu0 %v2951_v48 }
 0x5df   : > { %v2688_v26 = vpop.f32.mrf.mxu0 }
 0x5e1   : > { %v3461_v27 = vpop.f32.mrf.mxu0 }
 0x5e3   : > { %v2847_v28 = vpop.f32.mrf.mxu0 }
 0x5e4   : > { %v2848_v34 = vadd.f32 %v2847_v28, %v2688_v26 }
 0x5e5   : > { %v3485_v29 = vpop.f32.mrf.mxu0 }
 0x5ee   : > { %v2920_v33 = vpop.f32.mrf.mxu0 }
 0x5ef   : > { %v2924_v35 = vmul.f32 %v2920_v33, %v4119_v53  ;;  %v3203_v53 = vld [vmem:[%s4297_s19] ss:$0 sm:$0xff] }
 0x5f0   : > { %v3490_v36 = vpop.f32.mrf.mxu0 }
 0x5f1   : > { %v2925_v38 = vadd.f32 %v2924_v35, %v2848_v34 }
 0x5f3   : > { %v2933_v39 = vmul.f32 %v2932_v37, %v2925_v38 }
 0x5f5   : > { %v2934_v40 = vmul.f32 %v2933_v39, %v2933_v39 }
 0x5f7   : > { %v2935_v41 = vsel %vm2707_vm14, %v2934_v40, 0.0 }
 0x5f8   : > { %2936 = vadd.xlane.f32.xlu0 %v2935_v41 }
 0x681   : > { %v2937_v49 = vpop.xlane.xlu0 %2936 }
 0x682   : > { %v2939_v50 = vmul.f32 0.015625, %v2937_v49 }
 0x684   : > { %v2940_v51 = vadd.f32 1e-05, %v2939_v50 }
 0x686   : > { %3583 = vrsqrt.f32 %v2940_v51 }
 0x693   : > { %v3584_v52 = vpop.eup %3583 }
 0x694   : > { %v2942_v24 = vmul.f32 %v3584_v52, %v2933_v39 }
 0x696   : > { %v2950_v54 = vmul.f32 %v3203_v53, %v2942_v24 }
 0x698   : > { %3508 = vmatmul.mubr.msk.f32.vlgmr.msra.gmra.mxu0 %vm2707_vm14, %v2950_v54 }
 0x758   : > { %v3028_v55 = vpop.f32.mrf.mxu0 }
 0x759   : > { %v3029_v56 = vadd.f32 %v3028_v55, %v3843_v8 }
 0x75a   : > { %v3509_v57 = vpop.f32.mrf.mxu0 }
 0x75b   : > { %v3032_v1 = vsel %vm659_vm1, %v3029_v56, 0.0 }
 0x75c   : > { %3033 = vadd.xlane.f32.xlu0 %v3032_v1 }
 0x7e5   : > { %v3034_v58 = vpop.xlane.xlu0 %3033 }
 0x7e6   : > { %v3036_v4 = vmul.f32 0.03125, %v3034_v58 }
 0x7e8   : > { %v3037_v59 = vsub.f32 %v3029_v56, %v3036_v4 }
 0x7ea   : > { %v3038_v31 = vmul.f32 %v3037_v59, %v3037_v59 }
 0x7ec   : > { %v3039_v60 = vsel %vm659_vm1, %v3038_v31, 0.0 }
 0x7ed   : > { %3040 = vadd.xlane.f32.xlu1 %v3039_v60 }
 0x876   : > { %v3041_v61 = vpop.xlane.xlu1 %3040 }
 0x877   : > { %v3042_v62 = vmul.f32 0.03125, %v3041_v61 }
 0x879   : > { %v3043_v63 = vadd.f32 1e-05, %v3042_v62 }
 0x87b   : > { %3585 = vrsqrt.f32 %v3043_v63 }
 0x888   : > { %v3586_v8 = vpop.eup %3585 }
 0x889   : > { %v3045_v2 = vmul.f32 %v3586_v8, %v3037_v59 }
 0x88b   : > { %v3052_v19 = vmul.f32 %v3205_v0, %v3045_v2 }
 0x88d   : > { %v3059_v20 = vadd.f32 %v3206_v3, %v3052_v19 }
 0x88f   : > { %3060 = vst.msk [vmem:[%s647_s23] sm:$0xff] %vm659_vm1, %v3059_v20 }
 0x890   : > { %3600 = shalt.err (!%p3597_p3)
}
 0x891   : > { %s3601_s6 = scalar_lea.hbm %s3073_s9, 128  ;;  %s3605_s22 = scalar_lea.hbm %s4342_s8, 256 }
 0x892   : > { %p3602_p4 = scmp.ne.s32.totalorder %s3073_s9, %s3601_s6  ;;  %p3606_p9 = scmp.lt.s32.totalorder %s3073_s9, %s4342_s8 }
 0x893   : > { %p3607_p10 = scmp.lt.s32.totalorder %s3605_s22, %s3601_s6 }
 0x894   : > { %p3603_p7 = pnand %p3602_p4, %p3800_p5 }
 0x895   : > { %p3608_p11 = por %p3607_p10, %p3606_p9 }
 0x896   : > { %p3604_p8 = pneg %p3603_p7 }
 0x898   : > { %p3609_p12 = pnand %p3608_p11, %p3604_p8 }
 0x89a   : > { %3612 = shalt.err (!%p3609_p12)
}
 0x89b   : > { %3510 = dma.vmem_to_hbm [thread:$0]  (%p3800_p5), %s3076_s4, 128, %s3073_s9, %s3062_s10  }
 0x89c PF: > { %s4343_s27 = sld [smem:[#allocation7_spill]] }
 0x89d   : > { %s4344_s0 = sld [smem:[#allocation5_spill]] }
 0x8a2   : > { %p3516_p13 = scmp.ge.s32.totalorder %s4343_s27, 2 }
 0x8a3   : > { %s3087_s26 = sand.u32 1, %s4344_s0  }
 0x8a4   : > { %p3513_p0 = pnand %p3516_p13, %p3804_p6  ;;  %s3088_s29 = scalar_lea.sflag [#allocation3], %s3087_s26 }
 0x8a6   : > { %p3514_p1 = pneg %p3513_p0 }
 0x8a8   : > { %3630 = dma.done.wait (%p3514_p1), %s3088_s29, 128  }
 0x8a9   : > { %3632 = vsyncadd (%p3514_p1), %s3088_s29, 4294967168  ;;  %s4346_s27 = sld [smem:[#allocation8_spill]]  ;;  %s4349_s2 = smov %s3639_s25 }
 0x8aa   : > { %s4347_s1 = sld [smem:[#allocation6_spill]] }
 0x8ab   : > { %s4348_s26 = sld [smem:[#allocation9_spill]] }
 0x8af   : > { %p31_p2 = scmp.ge.s32.totalorder %s4346_s27, 4  }
 0x8b0   : > { %s4350_s25 = smov %s4347_s1 }
 0x8b1   :  { %33 = sbr.rel (!%p31_p2) target bundleno = 16 (0x10), region = 139 }
 0x8b6   :  { %3093 = vsyncpa [#allocation3], 1 }
 0x8b7   :  { %3095 = vsyncpa [#allocation3 + $0x1], 1 }

</bundles_post_ra>
